<compile_context>
chip_gen: v5e
topology: v5e:2x2
jax: 0.10.0
libtpu: 0.0.40
codegen_flags: <defaults>
</compile_context>

<pallas_src>
import functools
import heapq
import itertools

import numpy as np

import jax
import jax.numpy as jnp
from jax import lax
from jax.experimental import pallas as pl
from jax.experimental.pallas import tpu as pltpu

HIDDEN = 32          # logical hidden_size (distances divide by this)
HP = 128             # lane-padded hidden: every in-kernel vector is a full 128-lane vreg
FEATURE_DIM = 64     # feature_dim
GOAL_STEPS = 5       # num layers of goalpredictor LSTM
RNN_STEPS = 10       # action-RNN unroll length per expansion
N_ACTIONS, N_VERBS, N_NOUNS = 2513, 125, 352
N_HEADS_TOTAL = N_ACTIONS + N_VERBS + N_NOUNS                 # 2990
N_HEADS_PAD = ((N_HEADS_TOTAL + 127) // 128) * 128            # 3072 (lane-dense)
EPSILON = 1e-5       # goal_closeness
# goal_smoothness (self.delta) is never used in forward().

_VMEM = pl.BlockSpec(memory_space=pltpu.MemorySpace.VMEM)


# ----------------------------------------------------------------------------
# Weight padding helpers (zero padding => pad lanes stay exactly 0 everywhere)
# ----------------------------------------------------------------------------
def _pad2(w, rpad, cpad):
    return jnp.pad(w, ((0, rpad), (0, cpad)))


def _pad_gate_cols(w, h, hp):
    """Pad each of the 4 LSTM gate column blocks (i,f,g,o) from h to hp with zeros."""
    blocks = [w[..., k * h:(k + 1) * h] for k in range(4)]
    pad = [(0, 0)] * (w.ndim - 1) + [(0, hp - h)]
    return jnp.concatenate([jnp.pad(b, pad) for b in blocks], axis=-1)


def _pad_lstm_w(w, h, hp):
    """(rows, 4h) LSTM weight -> (hp, 4hp): per-gate column pad, then zero row pad."""
    w = _pad_gate_cols(w, h, hp)
    return jnp.pad(w, ((0, hp - w.shape[0]), (0, 0)))


# ----------------------------------------------------------------------------
# Kernel 1: prologue = time max-pool + feat_embedding Linear + 5-layer
#           goalpredictor LSTM (+ root goal distance), fully fused.
# ----------------------------------------------------------------------------
def _prologue_kernel(fm_ref, wemb_ref, bemb_ref, wih_ref, b_ref,
                     feat_ref, goal_ref, hid_ref, d_ref, *, hp, h_true, layers):
    # max over the time axis, fused (was a separate XLA reduce op)
    feat_max = jnp.max(fm_ref[...], axis=0, keepdims=True)                  # (1, F)
    feat = (jnp.dot(feat_max, wemb_ref[...], preferred_element_type=jnp.float32)
            + bemb_ref[...])                                                # (1, HP)
    feat_ref[...] = feat

    x = feat
    for l in range(layers):
        # h0 = c0 = 0 for every layer (seq_len == 1): the Whh@h0 term and the f*c0
        # term vanish; bih + bhh were pre-summed at make time.  wih_ref[0] holds only
        # the feat half of layer 0's W_ih (the action half multiplies all-zero input).
        gates = jnp.dot(x, wih_ref[l], preferred_element_type=jnp.float32) + b_ref[l]
        sg = jax.nn.sigmoid(gates)        # one EUP pass over the full (1, 4HP)
        th = jnp.tanh(gates)
        i = sg[:, 0:hp]
        g = th[:, 2 * hp:3 * hp]
        o = sg[:, 3 * hp:4 * hp]
        c = i * g
        h = o * jnp.tanh(c)
        hid_ref[pl.ds(l, 1), :] = h       # per-row store (no sublane concatenation)
        x = h
    goal_ref[...] = x

    diff = feat - x
    d = jnp.sum(diff * diff, keepdims=True) * (1.0 / h_true)               # (1, 1)
    lane = jax.lax.broadcasted_iota(jnp.int32, (1, 128), 1)
    d_ref[...] = jnp.where(lane == 0, d, 0.0)                              # lane-dense slab


def make_prologue_fn(params):
    H, F = HIDDEN, FEATURE_DIM
    gp = params["gp"]
    wemb = _pad2(params["feat_emb_w"], 0, HP - H)                          # (F, HP)
    bemb = _pad2(params["feat_emb_b"], 0, HP - H)                          # (1, HP)
    # layer-0 input is cat(feat, action) with action == 0 -> only rows [:H] contribute
    wih_stack = jnp.stack(
        [_pad_lstm_w(gp[0]["wih"][:H], H, HP)]
        + [_pad_lstm_w(gp[l]["wih"], H, HP) for l in range(1, GOAL_STEPS)], axis=0)
    b_stack = jnp.stack([_pad_gate_cols(gp[l]["bih"] + gp[l]["bhh"], H, HP)
                         for l in range(GOAL_STEPS)], axis=0)              # (5, 1, 4HP)

    kern = pl.pallas_call(
        functools.partial(_prologue_kernel, hp=HP, h_true=H, layers=GOAL_STEPS),
        out_shape=(jax.ShapeDtypeStruct((1, HP), jnp.float32),
                   jax.ShapeDtypeStruct((1, HP), jnp.float32),
                   jax.ShapeDtypeStruct((GOAL_STEPS, HP), jnp.float32),
                   jax.ShapeDtypeStruct((1, 128), jnp.float32)),
        in_specs=[_VMEM] * 5,
        out_specs=(_VMEM, _VMEM, _VMEM, _VMEM),
    )

    @jax.jit
    def prologue(tsn_feat_seq):
        return kern(tsn_feat_seq, wemb, bemb, wih_stack, b_stack)

    return prologue


# ----------------------------------------------------------------------------
# Kernel 2: one fused beam expansion = 10-step action RNN + featpredictor +
#           distances + device-side best-feat update + packed host slab.
# ----------------------------------------------------------------------------
def _expand_kernel(feat_ref, act_ref, goal_ref, best_ref,
                   wih_ref, whh_ref, b_ref, wp_ref, bp_ref,
                   acts_ref, feats_ref, best_out_ref, scal_ref,
                   *, hp, h_true, steps):
    feat = feat_ref[...]
    act0 = act_ref[...]
    goal = goal_ref[...]
    best = best_ref[...]

    # ---- fixed per-step input preactivation: cat(action_state, feat_state) ----
    xa = jnp.concatenate([act0, feat], axis=1)                             # (1, 2HP)
    xg = jnp.dot(xa, wih_ref[...], preferred_element_type=jnp.float32) + b_ref[...]

    # ---- 10-step action RNN with (h, c) = 0; Whh loaded once outside the loop ----
    whh = whh_ref[...]
    h = jnp.zeros((1, hp), jnp.float32)
    c = jnp.zeros((1, hp), jnp.float32)
    for k in range(steps):
        gates = xg + jnp.dot(h, whh, preferred_element_type=jnp.float32)
        sg = jax.nn.sigmoid(gates)        # single sigmoid/tanh over the full (1, 4HP)
        th = jnp.tanh(gates)
        i = sg[:, 0:hp]
        f = sg[:, hp:2 * hp]
        g = th[:, 2 * hp:3 * hp]
        o = sg[:, 3 * hp:4 * hp]
        c = f * c + i * g
        h = o * jnp.tanh(c)
        acts_ref[pl.ds(k, 1), :] = h      # per-row store; frees the vregs immediately
    acts = acts_ref[...]                                                   # (steps, HP)

    # ---- featpredictor: relu(cat(feat, act_k, goal) @ Wp + bp), concat-free ----
    base = (jnp.dot(feat, wp_ref[0:hp, :], preferred_element_type=jnp.float32)
            + jnp.dot(goal, wp_ref[2 * hp:3 * hp, :], preferred_element_type=jnp.float32)
            + bp_ref[...])                                                 # (1, HP)
    y = jnp.dot(acts, wp_ref[hp:2 * hp, :], preferred_element_type=jnp.float32) + base
    y = jnp.maximum(y, 0.0)               # dropout(p=0.7) -> identity (eval), then relu
    feats_ref[...] = y

    # ---- distances + the sequential "if closer then update best" final result ----
    inv_h = 1.0 / h_true
    diff = y - goal
    dists = jnp.sum(diff * diff, axis=1, keepdims=True) * inv_h            # (steps, 1)
    bd = best - goal
    best_d = jnp.sum(bd * bd, keepdims=True) * inv_h                       # (1, 1)
    min_d = jnp.min(dists, axis=0, keepdims=True)                          # (1, 1)

    # first candidate attaining min_d == the one the in-loop "<" chain ends on
    rowf = jax.lax.broadcasted_iota(jnp.int32, (steps, 1), 0).astype(jnp.float32)
    eq = (dists == min_d).astype(jnp.float32)
    idx = eq * rowf + (1.0 - eq) * float(steps)
    sel_idx = jnp.min(idx, axis=0, keepdims=True)                          # (1, 1)
    sel = (rowf == sel_idx).astype(jnp.float32)                            # (steps, 1)
    cand = jnp.sum(sel * y, axis=0, keepdims=True)                         # (1, HP)
    upd = (min_d < best_d).astype(jnp.float32)                             # (1, 1)
    best_out_ref[...] = upd * cand + (1.0 - upd) * best

    # ---- lane-dense host slab: dists in lanes 0..steps-1, best_d in lane `steps` ----
    row = jax.lax.broadcasted_iota(jnp.int32, (steps, 128), 0)
    lane_s = jax.lax.broadcasted_iota(jnp.int32, (steps, 128), 1)
    dist_row = jnp.sum(jnp.where(row == lane_s, dists, 0.0), axis=0, keepdims=True)
    lane = jax.lax.broadcasted_iota(jnp.int32, (1, 128), 1)
    scal_ref[...] = dist_row + jnp.where(lane == steps, best_d, 0.0)       # (1, 128)


def make_expand_fn(params, steps=RNN_STEPS):
    H = HIDDEN
    wih = params["rnn_wih"]                      # (2H, 4H), input order [action, feat]
    wih_cat = jnp.concatenate([_pad_lstm_w(wih[:H], H, HP),
                               _pad_lstm_w(wih[H:], H, HP)], axis=0)       # (2HP, 4HP)
    whh = _pad_lstm_w(params["rnn_whh"], H, HP)                            # (HP, 4HP)
    b = _pad_gate_cols(params["rnn_bih"] + params["rnn_bhh"], H, HP)       # (1, 4HP)
    wp = params["pred_w"]                        # (3H, H), cat order [feat, action, goal]
    wp_cat = jnp.concatenate([_pad2(wp[:H], HP - H, HP - H),
                              _pad2(wp[H:2 * H], HP - H, HP - H),
                              _pad2(wp[2 * H:], HP - H, HP - H)], axis=0)  # (3HP, HP)
    bp = _pad2(params["pred_b"], 0, HP - H)                                # (1, HP)

    kern = pl.pallas_call(
        functools.partial(_expand_kernel, hp=HP, h_true=H, steps=steps),
        out_shape=(jax.ShapeDtypeStruct((steps, HP), jnp.float32),
                   jax.ShapeDtypeStruct((steps, HP), jnp.float32),
                   jax.ShapeDtypeStruct((1, HP), jnp.float32),
                   jax.ShapeDtypeStruct((1, 128), jnp.float32)),
        in_specs=[_VMEM] * 9,
        out_specs=(_VMEM, _VMEM, _VMEM, _VMEM),
        input_output_aliases={3: 2},             # best_ref -> best_out_ref in place
    )

    @jax.jit
    def expand(feat_arr, feat_idx, act_arr, act_idx, goal_state, best_feat_state):
        # Row selection happens inside the same jitted dispatch (no host round-trip,
        # no per-row output buffers).
        feat = lax.dynamic_slice_in_dim(feat_arr, feat_idx, 1, axis=0)
        act = lax.dynamic_slice_in_dim(act_arr, act_idx, 1, axis=0)
        return kern(feat, act, goal_state, best_feat_state,
                    wih_cat, whh, b, wp_cat, bp)

    return expand


# ----------------------------------------------------------------------------
# Kernel 3: fused embedding2{action,verb,noun} -- one lane-dense bf16 matmul.
# ----------------------------------------------------------------------------
def _heads_kernel(x_ref, w_ref, b_ref, o_ref):
    x = x_ref[...].astype(jnp.bfloat16)
    o_ref[...] = (jnp.dot(x, w_ref[...], preferred_element_type=jnp.float32)
                  + b_ref[...])


def make_heads_fn(params):
    w = jnp.concatenate([params["e2a_w"], params["e2v_w"], params["e2n_w"]], axis=1)
    b = jnp.concatenate([params["e2a_b"], params["e2v_b"], params["e2n_b"]], axis=1)
    # pad rows 32->128 (matches lane-padded activations) and cols 2990->3072 (lane-dense)
    w = jnp.pad(w, ((0, HP - HIDDEN), (0, N_HEADS_PAD - N_HEADS_TOTAL))).astype(jnp.bfloat16)
    b = jnp.pad(b, ((0, 0), (0, N_HEADS_PAD - N_HEADS_TOTAL)))             # f32 bias

    @jax.jit
    def heads(x):                                 # x: (L, HP) f32
        y = pl.pallas_call(
            _heads_kernel,
            out_shape=jax.ShapeDtypeStruct((x.shape[0], N_HEADS_PAD), jnp.float32),
            in_specs=[_VMEM] * 3,
            out_specs=_VMEM,
        )(x, w, b)
        return (y[:, :N_ACTIONS],
                y[:, N_ACTIONS:N_ACTIONS + N_VERBS],
                y[:, N_ACTIONS + N_VERBS:N_HEADS_TOTAL])

    return heads


# ----------------------------------------------------------------------------
# Beam-search node.  action/feat states are stored as (device array, row index)
# so each expansion returns only 4 device buffers; rows are sliced with numpy
# only at chain-traversal time (one batched device_get).
# ----------------------------------------------------------------------------
class Node:
    __slots__ = ("act_arr", "act_idx", "feat_arr", "feat_idx", "goal_state",
                 "hidden", "score", "prev_node", "dist")

    def __init__(self, act_arr, act_idx, feat_arr, feat_idx, goal_state, hidden,
                 score, prev_node, dist):
        self.act_arr = act_arr
        self.act_idx = act_idx
        self.feat_arr = feat_arr
        self.feat_idx = feat_idx
        self.goal_state = goal_state
        self.hidden = hidden
        self.score = score
        self.prev_node = prev_node
        self.dist = dist


# ----------------------------------------------------------------------------
# Parameters (deterministic, PyTorch-style uniform(-1/sqrt(fan), 1/sqrt(fan)))
# ----------------------------------------------------------------------------
def init_params(key):
    H, F = HIDDEN, FEATURE_DIM
    keys = iter(jax.random.split(key, 64))

    def u(shape, fan):
        s = 1.0 / (fan ** 0.5)
        return jax.random.uniform(next(keys), shape, jnp.float32, -s, s)

    p = {}
    p["feat_emb_w"] = u((F, H), F)          # Linear weights stored transposed
    p["feat_emb_b"] = u((1, H), F)
    gp = []
    for l in range(GOAL_STEPS):
        in_dim = 2 * H if l == 0 else H
        gp.append(dict(wih=u((in_dim, 4 * H), H), whh=u((H, 4 * H), H),
                       bih=u((1, 4 * H), H), bhh=u((1, 4 * H), H)))
    p["gp"] = gp
    p["rnn_wih"] = u((2 * H, 4 * H), H)
    p["rnn_whh"] = u((H, 4 * H), H)
    p["rnn_bih"] = u((1, 4 * H), H)
    p["rnn_bhh"] = u((1, 4 * H), H)
    p["pred_w"] = u((3 * H, H), 3 * H)
    p["pred_b"] = u((1, H), 3 * H)
    p["e2a_w"] = u((H, N_ACTIONS), H)
    p["e2a_b"] = u((1, N_ACTIONS), H)
    p["e2v_w"] = u((H, N_VERBS), H)
    p["e2v_b"] = u((1, N_VERBS), H)
    p["e2n_w"] = u((H, N_NOUNS), H)
    p["e2n_b"] = u((1, N_NOUNS), H)
    # embedding2feature exists in __init__ but is unused in forward()
    return p


# ----------------------------------------------------------------------------
# Forward pass (matches Anticipator.forward)
# ----------------------------------------------------------------------------
class AnticipatorPallas:
    def __init__(self, params):
        self.params = params
        self._prologue = make_prologue_fn(params)
        self._expand = make_expand_fn(params)
        self._heads = make_heads_fn(params)

    def __call__(self, tsn_feat_seq):
        if tsn_feat_seq.ndim == 1:
            tsn_feat_seq = tsn_feat_seq[None, :]

        # prologue: max-pool + feat_embedding + 5-layer goalpredictor + root distance
        feat_arr, goal_state, hidden, d_slab = self._prologue(tsn_feat_seq)
        d_root = float(np.asarray(jax.device_get(d_slab))[0, 0])   # single root sync
        obs_acts = feat_arr.shape[0] + 1
        best_feat_state = feat_arr
        act_zero = jnp.zeros((1, HP), jnp.float32)

        pq = []
        counter = itertools.count()
        root = Node(act_zero, 0, feat_arr, 0, goal_state, hidden, 1.0, None, d_root)
        heapq.heappush(pq, (root.score, next(counter), root))
        qsize = 1
        end_nodes = []     # never appended inside the loop (as in the reference)
        endnodes = []
        last_popped = root
        while True:
            if qsize > obs_acts * 6:
                break
            if len(pq) != 0:
                _, _, n = heapq.heappop(pq)
            else:
                break
            last_popped = n
            goal_state = n.goal_state
            hidden = n.hidden
            if n.dist > EPSILON:          # cached at node creation -> no device sync
                endnodes.append(n)
                if len(end_nodes) >= obs_acts:
                    break
                # ONE fused kernel per expansion (single jit dispatch) and ONE
                # device_get of the lane-dense (1, 128) slab for all host scalars.
                acts, feats, new_best, scal = self._expand(
                    n.feat_arr, n.feat_idx, n.act_arr, n.act_idx,
                    goal_state, best_feat_state)
                scal_np = np.asarray(jax.device_get(scal))[0]
                dists = scal_np[:RNN_STEPS]
                running = float(scal_np[RNN_STEPS])   # dist(best_feat, goal)^2 / H
                for k in range(RNN_STEPS):
                    dk = float(dists[k])
                    sk = running - dk                 # score uses the running best so far
                    child = Node(acts, k, feats, k, goal_state, hidden, sk, n, dk)
                    heapq.heappush(pq, (sk, next(counter), child))
                    running = min(running, dk)        # sequential "if closer" update
                best_feat_state = new_best            # device-side first-min update
                qsize += RNN_STEPS - 1

        if len(end_nodes) == 0:
            if len(pq) != 0:
                end_nodes = [heapq.heappop(pq)[2] for _ in range(obs_acts)]
        if len(pq) == 0:
            print(len(end_nodes))
            print("empty")

        # ---- chain traversal: ONE batched device_get, then numpy row slicing ----
        ends = sorted(end_nodes, key=lambda nd: nd.score)
        fetch = {}

        def _reg(arr):
            fetch.setdefault(id(arr), arr)

        for n0 in ends:
            n = n0
            while n is not None:
                _reg(n.act_arr)
                _reg(n.feat_arr)
                _reg(n.goal_state)
                n = n.prev_node
        _reg(last_popped.feat_arr)
        keys = list(fetch.keys())
        vals = jax.device_get([fetch[k] for k in keys])
        host = {k: np.asarray(v) for k, v in zip(keys, vals)}

        def _chain_mean(n0, arr_of, idx_of):
            rows = []
            n = n0
            while n is not None:
                rows.append(host[id(arr_of(n))][idx_of(n)])
                n = n.prev_node
            return np.mean(np.stack(rows[::-1], axis=0), axis=0, keepdims=True)

        pred_action_states = np.concatenate(
            [_chain_mean(n0, lambda nd: nd.act_arr, lambda nd: nd.act_idx)
             for n0 in ends], axis=0).astype(np.float32)               # (L, HP)
        pred_feat_states = np.concatenate(
            [_chain_mean(n0, lambda nd: nd.feat_arr, lambda nd: nd.feat_idx)
             for n0 in ends], axis=0).astype(np.float32)
        pred_goal_states = np.concatenate(
            [_chain_mean(n0, lambda nd: nd.goal_state, lambda nd: 0)
             for n0 in ends], axis=0).astype(np.float32)

        # dropout(p=0.7) -> identity (eval); fused lane-dense classifier heads
        pred_actions, pred_verbs, pred_nouns = self._heads(
            jnp.asarray(pred_action_states))

        fs = host[id(last_popped.feat_arr)]
        feat_state_out = fs[last_popped.feat_idx:last_popped.feat_idx + 1, :HIDDEN]

        return (pred_actions, pred_verbs, pred_nouns,
                jnp.asarray(pred_feat_states[:, :HIDDEN]),
                jnp.asarray(pred_goal_states[:, :HIDDEN]),
                jnp.asarray(feat_state_out))


if __name__ == "__main__":
    key = jax.random.PRNGKey(0)
    pkey, xkey = jax.random.split(key)
    params = init_params(pkey)
    model = AnticipatorPallas(params)
    tsn_feat_seq = jax.random.normal(xkey, (8, FEATURE_DIM), jnp.float32)

    outs = model(tsn_feat_seq)
    outs = jax.block_until_ready(outs)
    pred_actions, pred_verbs, pred_nouns, pfeat, pgoal, fstate = outs

    L = pfeat.shape[0]
    assert pred_actions.shape == (L, N_ACTIONS)
    assert pred_verbs.shape == (L, N_VERBS)
    assert pred_nouns.shape == (L, N_NOUNS)
    assert pfeat.shape[1] == HIDDEN and pgoal.shape[1] == HIDDEN
    assert fstate.shape == (1, HIDDEN)
    print("KERNEL_OK")
</pallas_src>

<mosaic_0001>
module attributes {stable_mosaic.version = 11 : i64} {
  func.func @_prologue_kernel(%arg0: memref<8x64xf32, #tpu.memory_space<vmem>>, %arg1: memref<64x128xf32, #tpu.memory_space<vmem>>, %arg2: memref<1x128xf32, #tpu.memory_space<vmem>>, %arg3: memref<5x128x512xf32, #tpu.memory_space<vmem>>, %arg4: memref<5x1x512xf32, #tpu.memory_space<vmem>>, %arg5: memref<1x128xf32, #tpu.memory_space<vmem>>, %arg6: memref<1x128xf32, #tpu.memory_space<vmem>>, %arg7: memref<5x128xf32, #tpu.memory_space<vmem>>, %arg8: memref<1x128xf32, #tpu.memory_space<vmem>>) attributes {dimension_semantics = [], scalar_prefetch = 0 : i64, scratch_operands = 0 : i64, tpu.core_type = #tpu.core_type<tc>} {
    %c0 = arith.constant 0 : index
    %c0_0 = arith.constant 0 : index
    %0 = vector.load %arg0[%c0, %c0_0] : memref<8x64xf32, #tpu.memory_space<vmem>>, vector<8x64xf32>
    %cst = arith.constant dense<0xFF800000> : vector<64xf32>
    %1 = vector.multi_reduction <maximumf>, %0, %cst [0] : vector<8x64xf32> to vector<64xf32>
    %2 = vector.shape_cast %1 : vector<64xf32> to vector<1x64xf32>
    %c0_1 = arith.constant 0 : index
    %c0_2 = arith.constant 0 : index
    %3 = vector.load %arg1[%c0_1, %c0_2] : memref<64x128xf32, #tpu.memory_space<vmem>>, vector<64x128xf32>
    %cst_3 = arith.constant dense<0.000000e+00> : vector<1x128xf32>
    %4 = tpu.matmul %2, %3, %cst_3 {dimension_numbers = #tpu.dot_dimension_numbers<[1], [0], [0], [1], [0, 0, 1, 1], [], []>} : vector<1x64xf32>, vector<64x128xf32>, vector<1x128xf32> -> vector<1x128xf32>
    %c0_4 = arith.constant 0 : index
    %c0_5 = arith.constant 0 : index
    %5 = vector.load %arg2[%c0_4, %c0_5] : memref<1x128xf32, #tpu.memory_space<vmem>>, vector<1x128xf32>
    %6 = arith.addf %4, %5 : vector<1x128xf32>
    %c0_6 = arith.constant 0 : index
    %c0_7 = arith.constant 0 : index
    %7 = vector.load %arg5[%c0_6, %c0_7] : memref<1x128xf32, #tpu.memory_space<vmem>>, vector<1x128xf32>
    tpu.vector_store %arg5[%c0_6, %c0_7], %6 {strides = array<i32>} : memref<1x128xf32, #tpu.memory_space<vmem>>, vector<1x128xf32>,
    %c0_8 = arith.constant 0 : index
    %c0_9 = arith.constant 0 : index
    %c0_10 = arith.constant 0 : index
    %8 = vector.load %arg3[%c0_8, %c0_9, %c0_10] : memref<5x128x512xf32, #tpu.memory_space<vmem>>, vector<1x128x512xf32>
    %9 = vector.shape_cast %8 : vector<1x128x512xf32> to vector<128x512xf32>
    %cst_11 = arith.constant dense<0.000000e+00> : vector<1x512xf32>
    %10 = tpu.matmul %6, %9, %cst_11 {dimension_numbers = #tpu.dot_dimension_numbers<[1], [0], [0], [1], [0, 0, 1, 1], [], []>} : vector<1x128xf32>, vector<128x512xf32>, vector<1x512xf32> -> vector<1x512xf32>
    %c0_12 = arith.constant 0 : index
    %c0_13 = arith.constant 0 : index
    %c0_14 = arith.constant 0 : index
    %11 = vector.load %arg4[%c0_12, %c0_13, %c0_14] : memref<5x1x512xf32, #tpu.memory_space<vmem>>, vector<1x1x512xf32>
    %12 = vector.shape_cast %11 : vector<1x1x512xf32> to vector<1x512xf32>
    %13 = arith.addf %10, %12 : vector<1x512xf32>
    %14 = arith.negf %13 : vector<1x512xf32>
    %15 = math.exp %14 : vector<1x512xf32>
    %cst_15 = arith.constant 1.000000e+00 : f32
    %16 = vector.broadcast %cst_15 : f32 to vector<1x512xf32>
    %17 = arith.addf %16, %15 : vector<1x512xf32>
    %18 = arith.divf %16, %17 : vector<1x512xf32>
    %19 = math.tanh %13 : vector<1x512xf32>
    %20 = vector.extract_strided_slice %18 {offsets = [0, 0], sizes = [1, 128], strides = [1, 1]} : vector<1x512xf32> to vector<1x128xf32>
    %21 = vector.extract_strided_slice %19 {offsets = [0, 256], sizes = [1, 128], strides = [1, 1]} : vector<1x512xf32> to vector<1x128xf32>
    %22 = vector.extract_strided_slice %18 {offsets = [0, 384], sizes = [1, 128], strides = [1, 1]} : vector<1x512xf32> to vector<1x128xf32>
    %23 = arith.mulf %20, %21 : vector<1x128xf32>
    %24 = math.tanh %23 : vector<1x128xf32>
    %25 = arith.mulf %22, %24 : vector<1x128xf32>
    %c0_16 = arith.constant 0 : index
    %c0_17 = arith.constant 0 : index
    %26 = vector.load %arg7[%c0_16, %c0_17] : memref<5x128xf32, #tpu.memory_space<vmem>>, vector<1x128xf32>
    tpu.vector_store %arg7[%c0_16, %c0_17], %25 {strides = array<i32>} : memref<5x128xf32, #tpu.memory_space<vmem>>, vector<1x128xf32>,
    %c1 = arith.constant 1 : index
    %c0_18 = arith.constant 0 : index
    %c0_19 = arith.constant 0 : index
    %27 = vector.load %arg3[%c1, %c0_18, %c0_19] : memref<5x128x512xf32, #tpu.memory_space<vmem>>, vector<1x128x512xf32>
    %28 = vector.shape_cast %27 : vector<1x128x512xf32> to vector<128x512xf32>
    %cst_20 = arith.constant dense<0.000000e+00> : vector<1x512xf32>
    %29 = tpu.matmul %25, %28, %cst_20 {dimension_numbers = #tpu.dot_dimension_numbers<[1], [0], [0], [1], [0, 0, 1, 1], [], []>} : vector<1x128xf32>, vector<128x512xf32>, vector<1x512xf32> -> vector<1x512xf32>
    %c1_21 = arith.constant 1 : index
    %c0_22 = arith.constant 0 : index
    %c0_23 = arith.constant 0 : index
    %30 = vector.load %arg4[%c1_21, %c0_22, %c0_23] : memref<5x1x512xf32, #tpu.memory_space<vmem>>, vector<1x1x512xf32>
    %31 = vector.shape_cast %30 : vector<1x1x512xf32> to vector<1x512xf32>
    %32 = arith.addf %29, %31 : vector<1x512xf32>
    %33 = arith.negf %32 : vector<1x512xf32>
    %34 = math.exp %33 : vector<1x512xf32>
    %cst_24 = arith.constant 1.000000e+00 : f32
    %35 = vector.broadcast %cst_24 : f32 to vector<1x512xf32>
    %36 = arith.addf %35, %34 : vector<1x512xf32>
    %37 = arith.divf %35, %36 : vector<1x512xf32>
    %38 = math.tanh %32 : vector<1x512xf32>
    %39 = vector.extract_strided_slice %37 {offsets = [0, 0], sizes = [1, 128], strides = [1, 1]} : vector<1x512xf32> to vector<1x128xf32>
    %40 = vector.extract_strided_slice %38 {offsets = [0, 256], sizes = [1, 128], strides = [1, 1]} : vector<1x512xf32> to vector<1x128xf32>
    %41 = vector.extract_strided_slice %37 {offsets = [0, 384], sizes = [1, 128], strides = [1, 1]} : vector<1x512xf32> to vector<1x128xf32>
    %42 = arith.mulf %39, %40 : vector<1x128xf32>
    %43 = math.tanh %42 : vector<1x128xf32>
    %44 = arith.mulf %41, %43 : vector<1x128xf32>
    %c1_25 = arith.constant 1 : index
    %c0_26 = arith.constant 0 : index
    %45 = vector.load %arg7[%c1_25, %c0_26] : memref<5x128xf32, #tpu.memory_space<vmem>>, vector<1x128xf32>
    tpu.vector_store %arg7[%c1_25, %c0_26], %44 {strides = array<i32>} : memref<5x128xf32, #tpu.memory_space<vmem>>, vector<1x128xf32>,
    %c2 = arith.constant 2 : index
    %c0_27 = arith.constant 0 : index
    %c0_28 = arith.constant 0 : index
    %46 = vector.load %arg3[%c2, %c0_27, %c0_28] : memref<5x128x512xf32, #tpu.memory_space<vmem>>, vector<1x128x512xf32>
    %47 = vector.shape_cast %46 : vector<1x128x512xf32> to vector<128x512xf32>
    %cst_29 = arith.constant dense<0.000000e+00> : vector<1x512xf32>
    %48 = tpu.matmul %44, %47, %cst_29 {dimension_numbers = #tpu.dot_dimension_numbers<[1], [0], [0], [1], [0, 0, 1, 1], [], []>} : vector<1x128xf32>, vector<128x512xf32>, vector<1x512xf32> -> vector<1x512xf32>
    %c2_30 = arith.constant 2 : index
    %c0_31 = arith.constant 0 : index
    %c0_32 = arith.constant 0 : index
    %49 = vector.load %arg4[%c2_30, %c0_31, %c0_32] : memref<5x1x512xf32, #tpu.memory_space<vmem>>, vector<1x1x512xf32>
    %50 = vector.shape_cast %49 : vector<1x1x512xf32> to vector<1x512xf32>
    %51 = arith.addf %48, %50 : vector<1x512xf32>
    %52 = arith.negf %51 : vector<1x512xf32>
    %53 = math.exp %52 : vector<1x512xf32>
    %cst_33 = arith.constant 1.000000e+00 : f32
    %54 = vector.broadcast %cst_33 : f32 to vector<1x512xf32>
    %55 = arith.addf %54, %53 : vector<1x512xf32>
    %56 = arith.divf %54, %55 : vector<1x512xf32>
    %57 = math.tanh %51 : vector<1x512xf32>
    %58 = vector.extract_strided_slice %56 {offsets = [0, 0], sizes = [1, 128], strides = [1, 1]} : vector<1x512xf32> to vector<1x128xf32>
    %59 = vector.extract_strided_slice %57 {offsets = [0, 256], sizes = [1, 128], strides = [1, 1]} : vector<1x512xf32> to vector<1x128xf32>
    %60 = vector.extract_strided_slice %56 {offsets = [0, 384], sizes = [1, 128], strides = [1, 1]} : vector<1x512xf32> to vector<1x128xf32>
    %61 = arith.mulf %58, %59 : vector<1x128xf32>
    %62 = math.tanh %61 : vector<1x128xf32>
    %63 = arith.mulf %60, %62 : vector<1x128xf32>
    %c2_34 = arith.constant 2 : index
    %c0_35 = arith.constant 0 : index
    %64 = vector.load %arg7[%c2_34, %c0_35] : memref<5x128xf32, #tpu.memory_space<vmem>>, vector<1x128xf32>
    tpu.vector_store %arg7[%c2_34, %c0_35], %63 {strides = array<i32>} : memref<5x128xf32, #tpu.memory_space<vmem>>, vector<1x128xf32>,
    %c3 = arith.constant 3 : index
    %c0_36 = arith.constant 0 : index
    %c0_37 = arith.constant 0 : index
    %65 = vector.load %arg3[%c3, %c0_36, %c0_37] : memref<5x128x512xf32, #tpu.memory_space<vmem>>, vector<1x128x512xf32>
    %66 = vector.shape_cast %65 : vector<1x128x512xf32> to vector<128x512xf32>
    %cst_38 = arith.constant dense<0.000000e+00> : vector<1x512xf32>
    %67 = tpu.matmul %63, %66, %cst_38 {dimension_numbers = #tpu.dot_dimension_numbers<[1], [0], [0], [1], [0, 0, 1, 1], [], []>} : vector<1x128xf32>, vector<128x512xf32>, vector<1x512xf32> -> vector<1x512xf32>
    %c3_39 = arith.constant 3 : index
    %c0_40 = arith.constant 0 : index
    %c0_41 = arith.constant 0 : index
    %68 = vector.load %arg4[%c3_39, %c0_40, %c0_41] : memref<5x1x512xf32, #tpu.memory_space<vmem>>, vector<1x1x512xf32>
    %69 = vector.shape_cast %68 : vector<1x1x512xf32> to vector<1x512xf32>
    %70 = arith.addf %67, %69 : vector<1x512xf32>
    %71 = arith.negf %70 : vector<1x512xf32>
    %72 = math.exp %71 : vector<1x512xf32>
    %cst_42 = arith.constant 1.000000e+00 : f32
    %73 = vector.broadcast %cst_42 : f32 to vector<1x512xf32>
    %74 = arith.addf %73, %72 : vector<1x512xf32>
    %75 = arith.divf %73, %74 : vector<1x512xf32>
    %76 = math.tanh %70 : vector<1x512xf32>
    %77 = vector.extract_strided_slice %75 {offsets = [0, 0], sizes = [1, 128], strides = [1, 1]} : vector<1x512xf32> to vector<1x128xf32>
    %78 = vector.extract_strided_slice %76 {offsets = [0, 256], sizes = [1, 128], strides = [1, 1]} : vector<1x512xf32> to vector<1x128xf32>
    %79 = vector.extract_strided_slice %75 {offsets = [0, 384], sizes = [1, 128], strides = [1, 1]} : vector<1x512xf32> to vector<1x128xf32>
    %80 = arith.mulf %77, %78 : vector<1x128xf32>
    %81 = math.tanh %80 : vector<1x128xf32>
    %82 = arith.mulf %79, %81 : vector<1x128xf32>
    %c3_43 = arith.constant 3 : index
    %c0_44 = arith.constant 0 : index
    %83 = vector.load %arg7[%c3_43, %c0_44] : memref<5x128xf32, #tpu.memory_space<vmem>>, vector<1x128xf32>
    tpu.vector_store %arg7[%c3_43, %c0_44], %82 {strides = array<i32>} : memref<5x128xf32, #tpu.memory_space<vmem>>, vector<1x128xf32>,
    %c4 = arith.constant 4 : index
    %c0_45 = arith.constant 0 : index
    %c0_46 = arith.constant 0 : index
    %84 = vector.load %arg3[%c4, %c0_45, %c0_46] : memref<5x128x512xf32, #tpu.memory_space<vmem>>, vector<1x128x512xf32>
    %85 = vector.shape_cast %84 : vector<1x128x512xf32> to vector<128x512xf32>
    %cst_47 = arith.constant dense<0.000000e+00> : vector<1x512xf32>
    %86 = tpu.matmul %82, %85, %cst_47 {dimension_numbers = #tpu.dot_dimension_numbers<[1], [0], [0], [1], [0, 0, 1, 1], [], []>} : vector<1x128xf32>, vector<128x512xf32>, vector<1x512xf32> -> vector<1x512xf32>
    %c4_48 = arith.constant 4 : index
    %c0_49 = arith.constant 0 : index
    %c0_50 = arith.constant 0 : index
    %87 = vector.load %arg4[%c4_48, %c0_49, %c0_50] : memref<5x1x512xf32, #tpu.memory_space<vmem>>, vector<1x1x512xf32>
    %88 = vector.shape_cast %87 : vector<1x1x512xf32> to vector<1x512xf32>
    %89 = arith.addf %86, %88 : vector<1x512xf32>
    %90 = arith.negf %89 : vector<1x512xf32>
    %91 = math.exp %90 : vector<1x512xf32>
    %cst_51 = arith.constant 1.000000e+00 : f32
    %92 = vector.broadcast %cst_51 : f32 to vector<1x512xf32>
    %93 = arith.addf %92, %91 : vector<1x512xf32>
    %94 = arith.divf %92, %93 : vector<1x512xf32>
    %95 = math.tanh %89 : vector<1x512xf32>
    %96 = vector.extract_strided_slice %94 {offsets = [0, 0], sizes = [1, 128], strides = [1, 1]} : vector<1x512xf32> to vector<1x128xf32>
    %97 = vector.extract_strided_slice %95 {offsets = [0, 256], sizes = [1, 128], strides = [1, 1]} : vector<1x512xf32> to vector<1x128xf32>
    %98 = vector.extract_strided_slice %94 {offsets = [0, 384], sizes = [1, 128], strides = [1, 1]} : vector<1x512xf32> to vector<1x128xf32>
    %99 = arith.mulf %96, %97 : vector<1x128xf32>
    %100 = math.tanh %99 : vector<1x128xf32>
    %101 = arith.mulf %98, %100 : vector<1x128xf32>
    %c4_52 = arith.constant 4 : index
    %c0_53 = arith.constant 0 : index
    %102 = vector.load %arg7[%c4_52, %c0_53] : memref<5x128xf32, #tpu.memory_space<vmem>>, vector<1x128xf32>
    tpu.vector_store %arg7[%c4_52, %c0_53], %101 {strides = array<i32>} : memref<5x128xf32, #tpu.memory_space<vmem>>, vector<1x128xf32>,
    %c0_54 = arith.constant 0 : index
    %c0_55 = arith.constant 0 : index
    %103 = vector.load %arg6[%c0_54, %c0_55] : memref<1x128xf32, #tpu.memory_space<vmem>>, vector<1x128xf32>
    tpu.vector_store %arg6[%c0_54, %c0_55], %101 {strides = array<i32>} : memref<1x128xf32, #tpu.memory_space<vmem>>, vector<1x128xf32>,
    %104 = arith.subf %6, %101 : vector<1x128xf32>
    %105 = arith.mulf %104, %104 : vector<1x128xf32>
    %106 = vector.shape_cast %105 : vector<1x128xf32> to vector<1x1x128xf32>
    %cst_56 = arith.constant dense<0.000000e+00> : vector<1xf32>
    %107 = vector.multi_reduction <add>, %106, %cst_56 [1, 2] : vector<1x1x128xf32> to vector<1xf32>
    %108 = vector.shape_cast %107 : vector<1xf32> to vector<1x1x1xf32>
    %109 = vector.extract %108[0, 0, 0] : f32 from vector<1x1x1xf32>
    %110 = vector.broadcast %109 : f32 to vector<1x1xf32>
    %cst_57 = arith.constant 3.125000e-02 : f32
    %111 = vector.broadcast %cst_57 : f32 to vector<1x1xf32>
    %112 = arith.mulf %110, %111 : vector<1x1xf32>
    %113 = tpu.iota {dimensions = array<i32: 1>} : vector<1x128xi32>
    %c0_i32 = arith.constant 0 : i32
    %114 = vector.broadcast %c0_i32 : i32 to vector<1x128xi32>
    %115 = arith.cmpi eq, %113, %114 : vector<1x128xi32>
    %cst_58 = arith.constant 0.000000e+00 : f32
    %116 = vector.shape_cast %112 : vector<1x1xf32> to vector<1x1xf32>
    %117 = vector.broadcast %116 : vector<1x1xf32> to vector<1x128xf32>
    %118 = vector.broadcast %cst_58 : f32 to vector<1x128xf32>
    %119 = arith.select %115, %117, %118 : vector<1x128xi1>, vector<1x128xf32>
    %c0_59 = arith.constant 0 : index
    %c0_60 = arith.constant 0 : index
    %120 = vector.load %arg8[%c0_59, %c0_60] : memref<1x128xf32, #tpu.memory_space<vmem>>, vector<1x128xf32>
    tpu.vector_store %arg8[%c0_59, %c0_60], %119 {strides = array<i32>} : memref<1x128xf32, #tpu.memory_space<vmem>>, vector<1x128xf32>,
    return
  }
}

</mosaic_0001>

<bundles_post_ra>
// kernel: prologue.1
= control target key start
LH: loop header
LB: loop body
LE: loop exit
PB: predicated region body
PF: predicated region fallthrough
CT: control target
= control target key end

     0   :  { %14 = vsyncpa [#allocation3], 0  ;;  %s1465_s0 = inlined_call_operand.hbm [shape: f32[8,64], index: 0, kind: input, shape index: {}]   ;;  %s1466_s1 = inlined_call_operand.hbm [shape: f32[64,128], index: 1, kind: input, shape index: {}]   ;;  %s1467_s2 = inlined_call_operand.hbm [shape: f32[1,128], index: 2, kind: input, shape index: {}]   ;;  %s1468_s3 = inlined_call_operand.hbm [shape: f32[5,128,512], index: 3, kind: input, shape index: {}]   ;;  %s1469_s4 = inlined_call_operand.hbm [shape: f32[5,1,512], index: 4, kind: input, shape index: {}]   ;;  %s1470_s5 = inlined_call_operand.hbm [shape: f32[1,128], index: 5, kind: output, shape index: {0}]   ;;  %s1471_s6 = inlined_call_operand.hbm [shape: f32[1,128], index: 6, kind: output, shape index: {1}]   ;;  %s1472_s7 = inlined_call_operand.hbm [shape: f32[5,128], index: 7, kind: output, shape index: {2}]   ;;  %s1473_s8 = inlined_call_operand.hbm [shape: f32[1,128], index: 8, kind: output, shape index: {3}]  }
   0x1   :  { %15 = vsyncpa [#allocation6], 0 }
   0x2   :  { %16 = vsyncpa [#allocation9], 0 }
   0x3   :  { %17 = vsyncpa [#allocation4], 0 }
   0x4   :  { %18 = vsyncpa [#allocation13], 0  ;;  %s35_s29 = sshll.u32 %s1466_s1, 4  ;;  %s36_s29 = int_to_ptr.hbm [resolvable:$true] %s35_s29 }
   0x5   :  { %19 = vsyncpa [#allocation16], 0  ;;  %s1349_s30 = smov [#allocation5]   ;;  %s59_s12 = sshll.u32 %s1468_s3, 4  ;;  %s60_s12 = int_to_ptr.hbm [resolvable:$true] %s59_s12 }
   0x6   :  { %s37_s9 = sshll.u32 %s1349_s30, 4  ;;  %s1350_s13 = smov 128   ;;  %s38_s9 = int_to_ptr.vmem [resolvable:$true] %s37_s9 }
   0x7   :  { %s1351_s14 = smov 8   ;;  %s1352_s15 = smov [#allocation8]  }
   0x8   :  { %43 = dma.hbm_to_vmem [thread:$0]  %s36_s29, 1024, %s38_s9, [#allocation6], %s1350_s13, %s1350_s13, %s1351_s14  }
   0x9   :  { %s61_s16 = sshll.u32 %s1352_s15, 4  ;;  %s1353_s17 = smov 512   ;;  %s62_s16 = int_to_ptr.vmem [resolvable:$true] %s61_s16 }
   0xa   :  { %s1354_s18 = smov 32   ;;  %s25_s20 = sshll.u32 %s1465_s0, 4  ;;  %s26_s20 = int_to_ptr.hbm [resolvable:$true] %s25_s20 }
   0xb   :  { %67 = dma.hbm_to_vmem [thread:$0]  %s60_s12, 40960, %s62_s16, [#allocation9], %s1353_s17, %s1353_s17, %s1354_s18  }
   0xc   :  { %s1355_s21 = smov [#allocation2]   ;;  %s49_s24 = sshll.u32 %s1467_s2, 4  ;;  %s50_s24 = int_to_ptr.hbm [resolvable:$true] %s49_s24 }
   0xd   :  { %s27_s22 = sshll.u32 %s1355_s21, 4  ;;  %s1356_s25 = smov [#allocation7]   ;;  %s28_s22 = int_to_ptr.vmem [resolvable:$true] %s27_s22 }
   0xe   :  { %30 = dma.hbm_to_vmem [thread:$0]  %s26_s20, 128, %s28_s22, [#allocation3]  }
   0xf   :  { %s51_s26 = sshll.u32 %s1356_s25, 4  ;;  %s72_s29 = sshll.u32 %s1469_s4, 4  ;;  %s52_s26 = int_to_ptr.vmem [resolvable:$true] %s51_s26  ;;  %s73_s29 = int_to_ptr.hbm [resolvable:$true] %s72_s29 }
  0x10   :  { %54 = dma.hbm_to_vmem [thread:$0]  %s50_s24, 16, %s52_s26, [#allocation6]  }
  0x11   :  { %s1357_s0 = smov [#allocation10]   ;;  %s1358_s9 = smov 64  }
  0x12   :  { %s74_s30 = sshll.u32 %s1357_s0, 4  ;;  %s1359_s10 = smov 4   ;;  %s75_s30 = int_to_ptr.vmem [resolvable:$true] %s74_s30 }
  0x13   :  { %80 = dma.hbm_to_vmem [thread:$0]  %s73_s29, 320, %s75_s30, [#allocation9], %s1358_s9, %s1358_s9, %s1359_s10  }
  0x14   :  { %1337 = dma.done.wait [#allocation3], 128  }
  0x15   :  { %1338 = vsyncadd [#allocation3], 4294967168 }
  0x16   :  { %1339 = dma.done.wait [#allocation6], 1040  }
  0x17   :  { %1340 = vsyncadd [#allocation6], 4294966256 }
  0x18   :  { %1341 = dma.done.wait [#allocation9], 41280  }
  0x19   :  { %1342 = vsyncadd [#allocation9], 4294926016  ;;  %v117_v0 = vld [vmem:[#allocation5 + $0x38] sm:$0xff]  ;;  %v116_v1 = vld [vmem:[#allocation5 + $0x30] sm:$0xff]  ;;  %vm102_vm0 = vcmask 523264   ;;  %s1360_s2 = smov [#allocation12]  }
  0x1a   :  { %130 = vmatpush.msra.mxu0 %v117_v0  ;;  %v115_v2 = vld [vmem:[#allocation5 + $0x28] sm:$0xff]  ;;  %v114_v3 = vld [vmem:[#allocation5 + $0x20] sm:$0xff]  ;;  %v101_v4 = vld [vmem:[#allocation2] sm:$0xff]  ;;  %s983_s4 = sshll.u32 %s1360_s2, 4  ;;  %s985_s13 = sshll.u32 %s1471_s6, 4  ;;  %s984_s4 = int_to_ptr.vmem [resolvable:$true] %s983_s4  ;;  %s986_s13 = int_to_ptr.hbm [resolvable:$true] %s985_s13 }
  0x1b   :  { %v103_v5 = vsel %vm102_vm0, %v101_v4, -inf  ;;  %v188_v6 = vld [vmem:[#allocation8 + $0x1e0] sm:$0xff]  ;;  %v189_v7 = vld [vmem:[#allocation8 + $0x1f0] sm:$0xff]  ;;  %v190_v8 = vld [vmem:[#allocation8 + $0x1f8] sm:$0xff]  ;;  %s974_s16 = sshll.u32 %s1470_s5, 4  ;;  %s1361_s17 = smov [#allocation11]   ;;  %s975_s16 = int_to_ptr.hbm [resolvable:$true] %s974_s16 }
  0x1c   :  { %131 = vmatpush.msra.mxu0 %v116_v1  ;;  %v104_v9 = vrot.slane %v103_v5, 4  ;;  %199 = vmatpush.msra.mxu1 %v188_v6  ;;  %v185_v10 = vld [vmem:[#allocation8 + $0x1c0] sm:$0xff]  ;;  %v186_v11 = vld [vmem:[#allocation8 + $0x1d0] sm:$0xff]  ;;  %v187_v12 = vld [vmem:[#allocation8 + $0x1d8] sm:$0xff]  ;;  %s972_s18 = sshll.u32 %s1361_s17, 4  ;;  %s1362_s1 = smov [#allocation14]   ;;  %s973_s18 = int_to_ptr.vmem [resolvable:$true] %s972_s18 }
  0x1d   :  { %219 = vmatpush.msra.mxu2 %v189_v7  ;;  %239 = vmatpush.msra.mxu3 %v190_v8  ;;  %v182_v13 = vld [vmem:[#allocation8 + $0x1a0] sm:$0xff]  ;;  %v183_v14 = vld [vmem:[#allocation8 + $0x1b0] sm:$0xff]  ;;  %v184_v17 = vld [vmem:[#allocation8 + $0x1b8] sm:$0xff]  ;;  %s994_s19 = sshll.u32 %s1362_s1, 4  ;;  %s996_s22 = sshll.u32 %s1472_s7, 4  ;;  %s995_s19 = int_to_ptr.vmem [resolvable:$true] %s994_s19  ;;  %s997_s22 = int_to_ptr.hbm [resolvable:$true] %s996_s22 }
  0x1e   :  { %132 = vmatpush.msra.mxu0 %v115_v2  ;;  %v113_v15 = vld [vmem:[#allocation5 + $0x18] sm:$0xff]  ;;  %v105_v16 = vmax.f32 %v103_v5, %v104_v9  ;;  %200 = vmatpush.msra.mxu1 %v185_v10  ;;  %v179_v18 = vld [vmem:[#allocation8 + $0x180] sm:$0xff]  ;;  %v112_v20 = vld [vmem:[#allocation5 + $0x10] sm:$0xff]  ;;  %s1007_s23 = sshll.u32 %s1473_s8, 4  ;;  %s1363_s24 = smov [#allocation15]   ;;  %s1008_s23 = int_to_ptr.hbm [resolvable:$true] %s1007_s23 }
  0x1f   :  { %220 = vmatpush.msra.mxu2 %v186_v11  ;;  %240 = vmatpush.msra.mxu3 %v187_v12  ;;  %v180_v19 = vld [vmem:[#allocation8 + $0x190] sm:$0xff]  ;;  %v181_v22 = vld [vmem:[#allocation8 + $0x198] sm:$0xff]  ;;  %v176_v23 = vld [vmem:[#allocation8 + $0x160] sm:$0xff]  ;;  %s1005_s7 = sshll.u32 %s1363_s24, 4  ;;  %s1006_s7 = int_to_ptr.vmem [resolvable:$true] %s1005_s7 }
  0x20   :  { %133 = vmatpush.msra.mxu0 %v114_v3  ;;  %v106_v21 = vrot.slane %v105_v16, 2  ;;  %201 = vmatpush.msra.mxu1 %v182_v13  ;;  %v177_v24 = vld [vmem:[#allocation8 + $0x170] sm:$0xff]  ;;  %v111_v25 = vld [vmem:[#allocation5 + $0x8] sm:$0xff]  ;;  %v178_v27 = vld [vmem:[#allocation8 + $0x178] sm:$0xff] }
  0x21   :  { %221 = vmatpush.msra.mxu2 %v183_v14  ;;  %241 = vmatpush.msra.mxu3 %v184_v17  ;;  %v173_v28 = vld [vmem:[#allocation8 + $0x140] sm:$0xff]  ;;  %v174_v29 = vld [vmem:[#allocation8 + $0x150] sm:$0xff]  ;;  %v175_v32 = vld [vmem:[#allocation8 + $0x158] sm:$0xff] }
  0x22   :  { %134 = vmatpush.msra.mxu0 %v113_v15  ;;  %v107_v26 = vmax.f32 %v105_v16, %v106_v21  ;;  %202 = vmatpush.msra.mxu1 %v179_v18  ;;  %v110_v30 = vld [vmem:[#allocation5] sm:$0xff]  ;;  %v171_v35 = vld [vmem:[#allocation8 + $0x130] sm:$0xff] }
  0x23   :  { %222 = vmatpush.msra.mxu2 %v180_v19  ;;  %242 = vmatpush.msra.mxu3 %v181_v22  ;;  %v170_v33 = vld [vmem:[#allocation8 + $0x120] sm:$0xff]  ;;  %v172_v36 = vld [vmem:[#allocation8 + $0x138] sm:$0xff]  ;;  %v168_v38 = vld [vmem:[#allocation8 + $0x110] sm:$0xff] }
  0x24   :  { %135 = vmatpush.msra.mxu0 %v112_v20  ;;  %v108_v31 = vrot.slane %v107_v26, 1  ;;  %203 = vmatpush.msra.mxu1 %v176_v23  ;;  %v167_v37 = vld [vmem:[#allocation8 + $0x100] sm:$0xff]  ;;  %v169_v39 = vld [vmem:[#allocation8 + $0x118] sm:$0xff]  ;;  %v165_v41 = vld [vmem:[#allocation8 + $0xf0] sm:$0xff] }
  0x25   :  { %223 = vmatpush.msra.mxu2 %v177_v24  ;;  %243 = vmatpush.msra.mxu3 %v178_v27  ;;  %v164_v40 = vld [vmem:[#allocation8 + $0xe0] sm:$0xff]  ;;  %v166_v42 = vld [vmem:[#allocation8 + $0xf8] sm:$0xff]  ;;  %v162_v44 = vld [vmem:[#allocation8 + $0xd0] sm:$0xff] }
  0x26   :  { %136 = vmatpush.msra.mxu0 %v111_v25  ;;  %v109_v34 = vmax.f32 %v107_v26, %v108_v31  ;;  %204 = vmatpush.msra.mxu1 %v173_v28  ;;  %v161_v43 = vld [vmem:[#allocation8 + $0xc0] sm:$0xff]  ;;  %v163_v45 = vld [vmem:[#allocation8 + $0xd8] sm:$0xff]  ;;  %v159_v47 = vld [vmem:[#allocation8 + $0xb0] sm:$0xff] }
  0x27   :  { %224 = vmatpush.msra.mxu2 %v174_v29  ;;  %244 = vmatpush.msra.mxu3 %v175_v32  ;;  %v158_v46 = vld [vmem:[#allocation8 + $0xa0] sm:$0xff]  ;;  %v160_v48 = vld [vmem:[#allocation8 + $0xb8] sm:$0xff]  ;;  %v156_v50 = vld [vmem:[#allocation8 + $0x90] sm:$0xff] }
  0x28   :  { %137 = vmatpush.msra.mxu0 %v110_v30  ;;  %205 = vmatpush.msra.mxu1 %v170_v33  ;;  %v155_v49 = vld [vmem:[#allocation8 + $0x80] sm:$0xff]  ;;  %v157_v51 = vld [vmem:[#allocation8 + $0x98] sm:$0xff]  ;;  %v153_v53 = vld [vmem:[#allocation8 + $0x70] sm:$0xff] }
  0x29   :  { %1033 = vmatmul.msk.f32.vlgmr.msra.gmra.mxu0 %vm102_vm0, %v109_v34  ;;  %225 = vmatpush.msra.mxu2 %v171_v35  ;;  %v152_v52 = vld [vmem:[#allocation8 + $0x60] sm:$0xff]  ;;  %v154_v54 = vld [vmem:[#allocation8 + $0x78] sm:$0xff]  ;;  %v150_v56 = vld [vmem:[#allocation8 + $0x50] sm:$0xff] }
  0x2a   :  { %245 = vmatpush.msra.mxu3 %v172_v36  ;;  %206 = vmatpush.msra.mxu1 %v167_v37  ;;  %v149_v55 = vld [vmem:[#allocation8 + $0x40] sm:$0xff]  ;;  %v151_v57 = vld [vmem:[#allocation8 + $0x58] sm:$0xff]  ;;  %v147_v59 = vld [vmem:[#allocation8 + $0x30] sm:$0xff] }
  0x2b   :  { %226 = vmatpush.msra.mxu2 %v168_v38  ;;  %v146_v58 = vld [vmem:[#allocation8 + $0x20] sm:$0xff]  ;;  %v148_v60 = vld [vmem:[#allocation8 + $0x38] sm:$0xff]  ;;  %v144_v62 = vld [vmem:[#allocation8 + $0x10] sm:$0xff] }
  0x2c   :  { %246 = vmatpush.msra.mxu3 %v169_v39  ;;  %207 = vmatpush.msra.mxu1 %v164_v40  ;;  %v143_v61 = vld [vmem:[#allocation8] sm:$0xff]  ;;  %v145_v63 = vld [vmem:[#allocation8 + $0x18] sm:$0xff]  ;;  %v349_v4 = vld [vmem:[#allocation8 + $0x3f0] sm:$0xff] }
  0x2d   :  { %227 = vmatpush.msra.mxu2 %v165_v41  ;;  %v118_v0 = vld [vmem:[#allocation7] sm:$0x1]  ;;  %v348_v3 = vld [vmem:[#allocation8 + $0x3e0] sm:$0xff]  ;;  %v346_v7 = vld [vmem:[#allocation8 + $0x3d0] sm:$0xff] }
  0x2e   :  { %247 = vmatpush.msra.mxu3 %v166_v42  ;;  %208 = vmatpush.msra.mxu1 %v161_v43  ;;  %v350_v5 = vld [vmem:[#allocation8 + $0x3f8] sm:$0xff]  ;;  %v345_v6 = vld [vmem:[#allocation8 + $0x3c0] sm:$0xff]  ;;  %v343_v10 = vld [vmem:[#allocation8 + $0x3b0] sm:$0xff] }
  0x2f   :  { %228 = vmatpush.msra.mxu2 %v162_v44  ;;  %360 = vmatpush.msrb.mxu0 %v348_v3  ;;  %v347_v8 = vld [vmem:[#allocation8 + $0x3d8] sm:$0xff]  ;;  %v342_v9 = vld [vmem:[#allocation8 + $0x3a0] sm:$0xff]  ;;  %v340_v13 = vld [vmem:[#allocation8 + $0x390] sm:$0xff] }
  0x30   :  { %248 = vmatpush.msra.mxu3 %v163_v45  ;;  %209 = vmatpush.msra.mxu1 %v158_v46  ;;  %v344_v11 = vld [vmem:[#allocation8 + $0x3b8] sm:$0xff]  ;;  %v339_v12 = vld [vmem:[#allocation8 + $0x380] sm:$0xff]  ;;  %v337_v16 = vld [vmem:[#allocation8 + $0x370] sm:$0xff] }
  0x31   :  { %229 = vmatpush.msra.mxu2 %v159_v47  ;;  %361 = vmatpush.msrb.mxu0 %v345_v6  ;;  %v341_v14 = vld [vmem:[#allocation8 + $0x398] sm:$0xff]  ;;  %v336_v15 = vld [vmem:[#allocation8 + $0x360] sm:$0xff]  ;;  %v334_v19 = vld [vmem:[#allocation8 + $0x350] sm:$0xff] }
  0x32   :  { %249 = vmatpush.msra.mxu3 %v160_v48  ;;  %210 = vmatpush.msra.mxu1 %v155_v49  ;;  %v338_v17 = vld [vmem:[#allocation8 + $0x378] sm:$0xff]  ;;  %v333_v18 = vld [vmem:[#allocation8 + $0x340] sm:$0xff]  ;;  %v331_v22 = vld [vmem:[#allocation8 + $0x330] sm:$0xff] }
  0x33   :  { %230 = vmatpush.msra.mxu2 %v156_v50  ;;  %362 = vmatpush.msrb.mxu0 %v342_v9  ;;  %v335_v20 = vld [vmem:[#allocation8 + $0x358] sm:$0xff]  ;;  %v330_v21 = vld [vmem:[#allocation8 + $0x320] sm:$0xff]  ;;  %v328_v25 = vld [vmem:[#allocation8 + $0x310] sm:$0xff] }
  0x34   :  { %250 = vmatpush.msra.mxu3 %v157_v51  ;;  %211 = vmatpush.msra.mxu1 %v152_v52  ;;  %v332_v23 = vld [vmem:[#allocation8 + $0x338] sm:$0xff]  ;;  %v327_v24 = vld [vmem:[#allocation8 + $0x300] sm:$0xff]  ;;  %v325_v29 = vld [vmem:[#allocation8 + $0x2f0] sm:$0xff] }
  0x35   :  { %231 = vmatpush.msra.mxu2 %v153_v53  ;;  %363 = vmatpush.msrb.mxu0 %v339_v12  ;;  %v329_v26 = vld [vmem:[#allocation8 + $0x318] sm:$0xff]  ;;  %v1432_v27 = vld [vmem:[#allocation10] sm:$0xf]  ;;  %v322_v33 = vld [vmem:[#allocation8 + $0x2d0] sm:$0xff] }
  0x36   :  { %251 = vmatpush.msra.mxu3 %v154_v54  ;;  %212 = vmatpush.msra.mxu1 %v149_v55  ;;  %v324_v28 = vld [vmem:[#allocation8 + $0x2e0] sm:$0xff]  ;;  %v326_v30 = vld [vmem:[#allocation8 + $0x2f8] sm:$0xff]  ;;  %v193_v31 = vperm.slane %v1432_v27, 0  ;;  %v319_v36 = vld [vmem:[#allocation8 + $0x2b0] sm:$0xff]  ;;  %v195_v49 = vperm.slane %v1432_v27, 3 }
  0x37   :  { %232 = vmatpush.msra.mxu2 %v150_v56  ;;  %364 = vmatpush.msrb.mxu0 %v336_v15  ;;  %v321_v32 = vld [vmem:[#allocation8 + $0x2c0] sm:$0xff]  ;;  %v323_v34 = vld [vmem:[#allocation8 + $0x2d8] sm:$0xff]  ;;  %v316_v41 = vld [vmem:[#allocation8 + $0x290] sm:$0xff] }
  0x38   :  { %252 = vmatpush.msra.mxu3 %v151_v57  ;;  %213 = vmatpush.msra.mxu1 %v146_v58  ;;  %v318_v35 = vld [vmem:[#allocation8 + $0x2a0] sm:$0xff]  ;;  %v320_v37 = vld [vmem:[#allocation8 + $0x2b8] sm:$0xff]  ;;  %v313_v44 = vld [vmem:[#allocation8 + $0x270] sm:$0xff] }
  0x39   :  { %233 = vmatpush.msra.mxu2 %v147_v59  ;;  %365 = vmatpush.msrb.mxu0 %v333_v18  ;;  %v315_v40 = vld [vmem:[#allocation8 + $0x280] sm:$0xff]  ;;  %v317_v42 = vld [vmem:[#allocation8 + $0x298] sm:$0xff]  ;;  %v310_v48 = vld [vmem:[#allocation8 + $0x250] sm:$0xff] }
  0x3a   :  { %253 = vmatpush.msra.mxu3 %v148_v60  ;;  %214 = vmatpush.msra.mxu1 %v143_v61  ;;  %v312_v43 = vld [vmem:[#allocation8 + $0x260] sm:$0xff]  ;;  %v314_v45 = vld [vmem:[#allocation8 + $0x278] sm:$0xff]  ;;  %v307_v52 = vld [vmem:[#allocation8 + $0x230] sm:$0xff] }
  0x3b   :  { %234 = vmatpush.msra.mxu2 %v144_v62  ;;  %366 = vmatpush.msrb.mxu0 %v330_v21  ;;  %v309_v47 = vld [vmem:[#allocation8 + $0x240] sm:$0xff]  ;;  %v311_v50 = vld [vmem:[#allocation8 + $0x258] sm:$0xff]  ;;  %v304_v56 = vld [vmem:[#allocation8 + $0x210] sm:$0xff]  ;;  %v194_v62 = vperm.slane %v1432_v27, 2 }
  0x3c   :  { %254 = vmatpush.msra.mxu3 %v145_v63  ;;  %380 = vmatpush.msrb.mxu1 %v349_v4  ;;  %v306_v51 = vld [vmem:[#allocation8 + $0x220] sm:$0xff]  ;;  %v308_v53 = vld [vmem:[#allocation8 + $0x238] sm:$0xff] }
  0x3d   :  { %400 = vmatpush.msrb.mxu2 %v350_v5  ;;  %367 = vmatpush.msrb.mxu0 %v327_v24  ;;  %v303_v55 = vld [vmem:[#allocation8 + $0x200] sm:$0xff]  ;;  %v305_v58 = vld [vmem:[#allocation8 + $0x218] sm:$0xff] }
  0x3e   :  { %381 = vmatpush.msrb.mxu1 %v346_v7 }
  0x3f   :  { %401 = vmatpush.msrb.mxu2 %v347_v8  ;;  %368 = vmatpush.msrb.mxu0 %v324_v28  ;;  %v509_v28 = vld [vmem:[#allocation8 + $0x5e0] sm:$0xff] }
  0x40   :  { %382 = vmatpush.msrb.mxu1 %v343_v10  ;;  %521 = vmatpush.msrb.mxu3 %v509_v28 }
  0x41   :  { %402 = vmatpush.msrb.mxu2 %v344_v11  ;;  %369 = vmatpush.msrb.mxu0 %v321_v32  ;;  %v507_v32 = vld [vmem:[#allocation8 + $0x5d0] sm:$0xff] }
  0x42   :  { %383 = vmatpush.msrb.mxu1 %v340_v13 }
  0x43   :  { %403 = vmatpush.msrb.mxu2 %v341_v14  ;;  %370 = vmatpush.msrb.mxu0 %v318_v35  ;;  %v504_v35 = vld [vmem:[#allocation8 + $0x5b0] sm:$0xff] }
  0x44   :  { %384 = vmatpush.msrb.mxu1 %v337_v16 }
  0x45   :  { %404 = vmatpush.msrb.mxu2 %v338_v17  ;;  %371 = vmatpush.msrb.mxu0 %v315_v40  ;;  %v497_v40 = vld [vmem:[#allocation8 + $0x560] sm:$0xff] }
  0x46   :  { %385 = vmatpush.msrb.mxu1 %v334_v19 }
  0x47   :  { %405 = vmatpush.msrb.mxu2 %v335_v20  ;;  %372 = vmatpush.msrb.mxu0 %v312_v43  ;;  %v494_v43 = vld [vmem:[#allocation8 + $0x540] sm:$0xff] }
  0x48   :  { %386 = vmatpush.msrb.mxu1 %v331_v22 }
  0x49   :  { %406 = vmatpush.msrb.mxu2 %v332_v23  ;;  %373 = vmatpush.msrb.mxu0 %v309_v47  ;;  %v492_v47 = vld [vmem:[#allocation8 + $0x530] sm:$0xff] }
  0x4a   :  { %387 = vmatpush.msrb.mxu1 %v328_v25 }
  0x4b   :  { %407 = vmatpush.msrb.mxu2 %v329_v26  ;;  %374 = vmatpush.msrb.mxu0 %v306_v51  ;;  %v489_v51 = vld [vmem:[#allocation8 + $0x510] sm:$0xff] }
  0x4c   :  { %388 = vmatpush.msrb.mxu1 %v325_v29  ;;  %v510_v29 = vld [vmem:[#allocation8 + $0x5f0] sm:$0xff] }
  0x4d   :  { %408 = vmatpush.msrb.mxu2 %v326_v30  ;;  %375 = vmatpush.msrb.mxu0 %v303_v55  ;;  %v511_v30 = vld [vmem:[#allocation8 + $0x5f8] sm:$0xff] }
  0x4e   :  { %389 = vmatpush.msrb.mxu1 %v322_v33  ;;  %v508_v33 = vld [vmem:[#allocation8 + $0x5d8] sm:$0xff] }
  0x4f   :  { %409 = vmatpush.msrb.mxu2 %v323_v34  ;;  %541 = vmatpush.msra.mxu0 %v510_v29  ;;  %v503_v34 = vld [vmem:[#allocation8 + $0x5a0] sm:$0xff]  ;;  %v487_v55 = vld [vmem:[#allocation8 + $0x4f8] sm:$0xff] }
  0x50   :  { %390 = vmatpush.msrb.mxu1 %v319_v36  ;;  %v505_v36 = vld [vmem:[#allocation8 + $0x5b8] sm:$0xff] }
  0x51   :  { %410 = vmatpush.msrb.mxu2 %v320_v37  ;;  %542 = vmatpush.msra.mxu0 %v507_v32  ;;  %v500_v37 = vld [vmem:[#allocation8 + $0x580] sm:$0xff] }
  0x52   :  { %391 = vmatpush.msrb.mxu1 %v316_v41  ;;  %v498_v41 = vld [vmem:[#allocation8 + $0x570] sm:$0xff] }
  0x53   :  { %411 = vmatpush.msrb.mxu2 %v317_v42  ;;  %543 = vmatpush.msra.mxu0 %v504_v35  ;;  %v499_v42 = vld [vmem:[#allocation8 + $0x578] sm:$0xff] }
  0x54   :  { %392 = vmatpush.msrb.mxu1 %v313_v44  ;;  %v495_v44 = vld [vmem:[#allocation8 + $0x550] sm:$0xff] }
  0x55   :  { %412 = vmatpush.msrb.mxu2 %v314_v45  ;;  %v496_v45 = vld [vmem:[#allocation8 + $0x558] sm:$0xff] }
  0x56   :  { %393 = vmatpush.msrb.mxu1 %v310_v48  ;;  %v493_v48 = vld [vmem:[#allocation8 + $0x538] sm:$0xff] }
  0x57   :  { %413 = vmatpush.msrb.mxu2 %v311_v50  ;;  %v488_v50 = vld [vmem:[#allocation8 + $0x500] sm:$0xff] }
  0x58   :  { %394 = vmatpush.msrb.mxu1 %v307_v52  ;;  %v490_v52 = vld [vmem:[#allocation8 + $0x518] sm:$0xff] }
  0x59   :  { %414 = vmatpush.msrb.mxu2 %v308_v53  ;;  %v485_v53 = vld [vmem:[#allocation8 + $0x4e0] sm:$0xff] }
  0x5a   :  { %395 = vmatpush.msrb.mxu1 %v304_v56 }
  0x5b   :  { %415 = vmatpush.msrb.mxu2 %v305_v58  ;;  %v483_v58 = vld [vmem:[#allocation8 + $0x4d0] sm:$0xff] }
  0xa6   :  { %v139_v1 = vpop.f32.mrf.mxu0 }
  0xa7   :  { %v1426_v2 = vadd.f32 %v139_v1, %v118_v0 }
  0xa9   :  { %142 = vst [vmem:[#allocation11] sm:$0x1] %v1426_v2  ;;  %215 = vmatmul.f32.vlgmr.msra.gmra.mxu1 %v1426_v2  ;;  %235 = vmatmul.f32.vlgmr.msra.gmra.mxu2 %v1426_v2 }
  0xaa   :  { %255 = vmatmul.f32.vlgmr.msra.gmra.mxu3 %v1426_v2  ;;  %561 = vmatpush.msra.mxu1 %v511_v30  ;;  %977 = dma.vmem_to_hbm [thread:$0]  %s973_s18, 16, %s975_s16, [#allocation4]  }
  0xac   :  { %562 = vmatpush.msra.mxu1 %v508_v33 }
  0xae   :  { %563 = vmatpush.msra.mxu1 %v505_v36 }
 0x126   :  { %v216_v38 = vpop.f32.mrf.mxu1 }
 0x127   :  { %v217_v39 = vadd.f32 %v216_v38, %v193_v31  ;;  %v506_v31 = vld [vmem:[#allocation8 + $0x5c0] sm:$0xff]  ;;  %v501_v38 = vld [vmem:[#allocation8 + $0x590] sm:$0xff] }
 0x128   :  { %522 = vmatpush.msrb.mxu3 %v506_v31  ;;  %544 = vmatpush.msra.mxu0 %v501_v38 }
 0x129   :  { %v1034_v46 = vmul.f32 -1.442695, %v217_v39  ;;  %v502_v39 = vld [vmem:[#allocation8 + $0x598] sm:$0xff] }
 0x12a   :  { %523 = vmatpush.msrb.mxu3 %v503_v34  ;;  %564 = vmatpush.msra.mxu1 %v502_v39 }
 0x12b   :  { %1061 = vpow2.f32 %v1034_v46  ;;  %545 = vmatpush.msra.mxu0 %v498_v41  ;;  %v491_v46 = vld [vmem:[#allocation8 + $0x520] sm:$0xff] }
 0x12c   :  { %v236_v63 = vpop.f32.mrf.mxu2  ;;  %524 = vmatpush.msrb.mxu3 %v500_v37  ;;  %565 = vmatpush.msra.mxu1 %v499_v42 }
 0x12d   :  { %v256_v54 = vpop.f32.mrf.mxu3  ;;  %v237_v4 = vadd.f32 %v236_v63, %v194_v62  ;;  %546 = vmatpush.msra.mxu0 %v495_v44  ;;  %v480_v62 = vld [vmem:[#allocation8 + $0x4b0] sm:$0xff]  ;;  %v481_v63 = vld [vmem:[#allocation8 + $0x4b8] sm:$0xff] }
 0x12e   :  { %v257_v57 = vadd.f32 %v256_v54, %v195_v49  ;;  %525 = vmatpush.msrb.mxu3 %v497_v40  ;;  %566 = vmatpush.msra.mxu1 %v496_v45  ;;  %v1437_v49 = vld [vmem:[#allocation10 + $0x4] sm:$0xf]  ;;  %v486_v54 = vld [vmem:[#allocation8 + $0x4f0] sm:$0xff] }
 0x12f   :  { %547 = vmatpush.msra.mxu0 %v492_v47  ;;  %v354_v56 = vperm.slane %v1437_v49, 0 }
 0x130   :  { %v1035_v59 = vmul.f32 -1.442695, %v257_v57  ;;  %526 = vmatpush.msrb.mxu3 %v494_v43  ;;  %567 = vmatpush.msra.mxu1 %v493_v48  ;;  %v482_v57 = vld [vmem:[#allocation8 + $0x4c0] sm:$0xff] }
 0x131   :  { %v1062_v60 = vpop.eup %1061  ;;  %548 = vmatpush.msra.mxu0 %v489_v51 }
 0x132   :  { %v265_v61 = vadd.f32 1.0, %v1062_v60  ;;  %1063 = vpow2.f32 %v1035_v59  ;;  %527 = vmatpush.msrb.mxu3 %v491_v46  ;;  %568 = vmatpush.msra.mxu1 %v490_v52  ;;  %v484_v59 = vld [vmem:[#allocation8 + $0x4d8] sm:$0xff] }
 0x133   :  { %549 = vmatpush.msra.mxu0 %v486_v54  ;;  %v671_v54 = vld [vmem:[#allocation8 + $0x7f0] sm:$0xff] }
 0x134   :  { %1065 = vrcp.f32 %v265_v61  ;;  %v278_v7 = vand.u32 2147483648, %v265_v61  ;;  %v276_v9 = vand.u32 2147483647, %v265_v61  ;;  %vm272_vm2 = vweird.f32 %v265_v61  ;;  %528 = vmatpush.msrb.mxu3 %v488_v50  ;;  %569 = vmatpush.msra.mxu1 %v487_v55  ;;  %v672_v55 = vld [vmem:[#allocation8 + $0x7f8] sm:$0xff] }
 0x135   :  { %550 = vmatpush.msra.mxu0 %v483_v58  ;;  %v669_v58 = vld [vmem:[#allocation8 + $0x7d8] sm:$0xff] }
 0x136   :  { %v279_v12 = vor.u32 1.1754944e-38, %v278_v7  ;;  %vm277_vm4 = vcmp.eq.f32.partialorder %v276_v9, 8.507059e+37  ;;  %529 = vmatpush.msrb.mxu3 %v485_v53  ;;  %570 = vmatpush.msra.mxu1 %v484_v59  ;;  %v356_v9 = vperm.slane %v1437_v49, 3  ;;  %v670_v53 = vld [vmem:[#allocation8 + $0x7e0] sm:$0xff] }
 0x137   :  { %551 = vmatpush.msra.mxu0 %v480_v62  ;;  %682 = vmatpush.msra.mxu2 %v670_v53  ;;  %v664_v59 = vld [vmem:[#allocation8 + $0x7a0] sm:$0xff] }
 0x138   :  { %v1064_v0 = vpop.eup %1063  ;;  %530 = vmatpush.msrb.mxu3 %v482_v57  ;;  %571 = vmatpush.msra.mxu1 %v481_v63  ;;  %v668_v57 = vld [vmem:[#allocation8 + $0x7d0] sm:$0xff]  ;;  %v661_v62 = vld [vmem:[#allocation8 + $0x780] sm:$0xff] }
 0x139   :  { %v266_v1 = vadd.f32 1.0, %v1064_v0  ;;  %v662_v63 = vld [vmem:[#allocation8 + $0x790] sm:$0xff] }
 0x13a   :  { %v1066_v3 = vpop.eup %1065 }
 0x13b   :  { %v268_v5 = vmul.f32 %v1066_v3, %v265_v61  ;;  %1067 = vrcp.f32 %v266_v1  ;;  %vm273_vm1 = vweird.f32 %v1066_v3  ;;  %v293_v20 = vand.u32 2147483648, %v266_v1  ;;  %v479_v61 = vld [vmem:[#allocation8 + $0x4a0] sm:$0xff] }
 0x13c   :  { %1069 = vtanh.f32 %v237_v4  ;;  %vm274_vm3 = vmor %vm272_vm2, %vm273_vm1  ;;  %vm287_vm6 = vweird.f32 %v266_v1  ;;  %v291_v22 = vand.u32 2147483647, %v266_v1  ;;  %531 = vmatpush.msrb.mxu3 %v479_v61  ;;  %v478_v4 = vld [vmem:[#allocation8 + $0x498] sm:$0xff] }
 0x13d   :  { %v269_v6 = vsub.f32 1.0, %v268_v5  ;;  %v294_v24 = vor.u32 1.1754944e-38, %v293_v20  ;;  %v473_v5 = vld [vmem:[#allocation8 + $0x460] sm:$0xff]  ;;  %572 = vmatpush.msra.mxu1 %v478_v4  ;;  %v466_v20 = vld [vmem:[#allocation8 + $0x418] sm:$0xff] }
 0x13e   :  { %vm292_vm8 = vcmp.eq.f32.partialorder %v291_v22, 8.507059e+37  ;;  %v666_v61 = vld [vmem:[#allocation8 + $0x7b8] sm:$0xff] }
 0x13f   :  { %v270_v8 = vmul.f32 %v1066_v3, %v269_v6  ;;  %v474_v6 = vld [vmem:[#allocation8 + $0x470] sm:$0xff]  ;;  %v660_v4 = vld [vmem:[#allocation8 + $0x778] sm:$0xff] }
 0x141   :  { %v1068_v10 = vpop.eup %1067  ;;  %v271_v11 = vadd.f32 %v1066_v3, %v270_v8  ;;  %v475_v8 = vld [vmem:[#allocation8 + $0x478] sm:$0xff] }
 0x142   :  { %v283_v13 = vmul.f32 %v1068_v10, %v266_v1  ;;  %v1070_v15 = vpop.eup %1069  ;;  %vm288_vm5 = vweird.f32 %v1068_v10  ;;  %v476_v1 = vld [vmem:[#allocation8 + $0x480] sm:$0xff]  ;;  %573 = vmatpush.msra.mxu1 %v475_v8  ;;  %v657_v8 = vld [vmem:[#allocation8 + $0x758] sm:$0xff] }
 0x143   :  { %v275_v14 = vsel %vm274_vm3, %v1066_v3, %v271_v11  ;;  %vm289_vm7 = vmor %vm287_vm6, %vm288_vm5  ;;  %v477_v3 = vld [vmem:[#allocation8 + $0x490] sm:$0xff]  ;;  %532 = vmatpush.msrb.mxu3 %v476_v1  ;;  %v658_v1 = vld [vmem:[#allocation8 + $0x760] sm:$0xff] }
 0x144   :  { %v280_v16 = vsel %vm277_vm4, %v279_v12, %v275_v14  ;;  %v284_v17 = vsub.f32 1.0, %v283_v13  ;;  %552 = vmatpush.msra.mxu0 %v477_v3  ;;  %v471_v11 = vld [vmem:[#allocation8 + $0x450] sm:$0xff]  ;;  %v472_v12 = vld [vmem:[#allocation8 + $0x458] sm:$0xff]  ;;  %v467_v13 = vld [vmem:[#allocation8 + $0x420] sm:$0xff] }
 0x145   :  { %v298_v18 = vmul.f32 %v1070_v15, %v280_v16  ;;  %533 = vmatpush.msrb.mxu3 %v473_v5  ;;  %v468_v14 = vld [vmem:[#allocation8 + $0x430] sm:$0xff]  ;;  %v469_v16 = vld [vmem:[#allocation8 + $0x438] sm:$0xff]  ;;  %574 = vmatpush.msra.mxu1 %v472_v12  ;;  %v1442_v5 = vld [vmem:[#allocation10 + $0x8] sm:$0xf] }
 0x146   :  { %v285_v19 = vmul.f32 %v1068_v10, %v284_v17  ;;  %553 = vmatpush.msra.mxu0 %v474_v6  ;;  %v659_v3 = vld [vmem:[#allocation8 + $0x770] sm:$0xff]  ;;  %v655_v6 = vld [vmem:[#allocation8 + $0x740] sm:$0xff]  ;;  %v654_v12 = vld [vmem:[#allocation8 + $0x738] sm:$0xff] }
 0x147   :  { %1071 = vtanh.f32 %v298_v18  ;;  %v464_v18 = vld [vmem:[#allocation8 + $0x400] sm:$0xff]  ;;  %575 = vmatpush.msra.mxu1 %v469_v16 }
 0x148   :  { %v286_v21 = vadd.f32 %v1068_v10, %v285_v19  ;;  %554 = vmatpush.msra.mxu0 %v471_v11  ;;  %v465_v19 = vld [vmem:[#allocation8 + $0x410] sm:$0xff] }
 0x149   :  { %576 = vmatpush.msra.mxu1 %v466_v20  ;;  %v653_v11 = vld [vmem:[#allocation8 + $0x730] sm:$0xff] }
 0x14a   :  { %v290_v23 = vsel %vm289_vm7, %v1068_v10, %v286_v21  ;;  %v470_v10 = vld [vmem:[#allocation8 + $0x440] sm:$0xff]  ;;  %555 = vmatpush.msra.mxu0 %v468_v14  ;;  %v650_v14 = vld [vmem:[#allocation8 + $0x710] sm:$0xff] }
 0x14b   :  { %v295_v26 = vsel %vm292_vm8, %v294_v24, %v290_v23  ;;  %534 = vmatpush.msrb.mxu3 %v470_v10  ;;  %v355_v24 = vperm.slane %v1437_v49, 2  ;;  %v652_v10 = vld [vmem:[#allocation8 + $0x720] sm:$0xff] }
 0x14c   :  { %556 = vmatpush.msra.mxu0 %v465_v19  ;;  %v648_v19 = vld [vmem:[#allocation8 + $0x6f8] sm:$0xff] }
 0x14d   :  { %v1072_v25 = vpop.eup %1071  ;;  %535 = vmatpush.msrb.mxu3 %v467_v13  ;;  %v649_v13 = vld [vmem:[#allocation8 + $0x700] sm:$0xff] }
 0x14e   :  { %v300_v27 = vmul.f32 %v1072_v25, %v295_v26 }
 0x14f   :  { %536 = vmatpush.msrb.mxu3 %v464_v18  ;;  %v647_v18 = vld [vmem:[#allocation8 + $0x6f0] sm:$0xff] }
 0x150   :  { %301 = vst [vmem:[#allocation14] sm:$0x1] %v300_v27  ;;  %376 = vmatmul.f32.vlgmr.msrb.gmra.mxu0 %v300_v27  ;;  %396 = vmatmul.f32.vlgmr.msrb.gmra.mxu1 %v300_v27 }
 0x151   :  { %416 = vmatmul.f32.vlgmr.msrb.gmra.mxu2 %v300_v27  ;;  %702 = vmatpush.msra.mxu3 %v671_v54 }
 0x152   :  { %722 = vmatpush.msrb.mxu0 %v672_v55 }
 0x153   :  { %703 = vmatpush.msra.mxu3 %v668_v57 }
 0x154   :  { %723 = vmatpush.msrb.mxu0 %v669_v58 }
 0x156   :  { %724 = vmatpush.msrb.mxu0 %v666_v61 }
 0x1cd   :  { %v377_v60 = vpop.f32.mrf.mxu0  ;;  %v397_v25 = vpop.f32.mrf.mxu1 }
 0x1ce   :  { %v378_v0 = vadd.f32 %v377_v60, %v354_v56  ;;  %v398_v29 = vadd.f32 %v397_v25, %v355_v24  ;;  %v667_v56 = vld [vmem:[#allocation8 + $0x7c0] sm:$0xff]  ;;  %v665_v60 = vld [vmem:[#allocation8 + $0x7b0] sm:$0xff]  ;;  %v645_v24 = vld [vmem:[#allocation8 + $0x6d8] sm:$0xff] }
 0x1cf   :  { %683 = vmatpush.msra.mxu2 %v667_v56  ;;  %704 = vmatpush.msra.mxu3 %v665_v60 }
 0x1d0   :  { %v1036_v7 = vmul.f32 -1.442695, %v378_v0  ;;  %v663_v0 = vld [vmem:[#allocation8 + $0x798] sm:$0xff] }
 0x1d1   :  { %684 = vmatpush.msra.mxu2 %v664_v59  ;;  %705 = vmatpush.msra.mxu3 %v662_v63 }
 0x1d2   :  { %1073 = vpow2.f32 %v1036_v7  ;;  %725 = vmatpush.msrb.mxu0 %v663_v0  ;;  %v656_v7 = vld [vmem:[#allocation8 + $0x750] sm:$0xff] }
 0x1d3   :  { %685 = vmatpush.msra.mxu2 %v661_v62  ;;  %706 = vmatpush.msra.mxu3 %v659_v3 }
 0x1d4   :  { %v417_v15 = vpop.f32.mrf.mxu2  ;;  %726 = vmatpush.msrb.mxu0 %v660_v4 }
 0x1d5   :  { %v418_v17 = vadd.f32 %v417_v15, %v356_v9  ;;  %686 = vmatpush.msra.mxu2 %v658_v1  ;;  %707 = vmatpush.msra.mxu3 %v656_v7  ;;  %v517_v9 = vperm.slane %v1442_v5, 3  ;;  %v651_v15 = vld [vmem:[#allocation8 + $0x718] sm:$0xff] }
 0x1d6   :  { %727 = vmatpush.msrb.mxu0 %v657_v8 }
 0x1d7   :  { %v1037_v21 = vmul.f32 -1.442695, %v418_v17  ;;  %687 = vmatpush.msra.mxu2 %v655_v6  ;;  %708 = vmatpush.msra.mxu3 %v653_v11  ;;  %v646_v17 = vld [vmem:[#allocation8 + $0x6e0] sm:$0xff] }
 0x1d8   :  { %v1074_v22 = vpop.eup %1073  ;;  %728 = vmatpush.msrb.mxu0 %v654_v12 }
 0x1d9   :  { %v426_v23 = vadd.f32 1.0, %v1074_v22  ;;  %1075 = vpow2.f32 %v1037_v21  ;;  %688 = vmatpush.msra.mxu2 %v652_v10  ;;  %709 = vmatpush.msra.mxu3 %v650_v14  ;;  %v643_v21 = vld [vmem:[#allocation8 + $0x6c0] sm:$0xff]  ;;  %v644_v22 = vld [vmem:[#allocation8 + $0x6d0] sm:$0xff] }
 0x1da   :  { %729 = vmatpush.msrb.mxu0 %v651_v15  ;;  %v831_v15 = vld [vmem:[#allocation8 + $0x9e0] sm:$0xff] }
 0x1db   :  { %1077 = vrcp.f32 %v426_v23  ;;  %v439_v32 = vand.u32 2147483648, %v426_v23  ;;  %v437_v34 = vand.u32 2147483647, %v426_v23  ;;  %vm433_vm10 = vweird.f32 %v426_v23  ;;  %689 = vmatpush.msra.mxu2 %v649_v13  ;;  %710 = vmatpush.msra.mxu3 %v647_v18  ;;  %v828_v18 = vld [vmem:[#allocation8 + $0x9c0] sm:$0xff] }
 0x1dc   :  { %730 = vmatpush.msrb.mxu0 %v648_v19  ;;  %843 = vmatpush.msrb.mxu1 %v831_v15  ;;  %v829_v19 = vld [vmem:[#allocation8 + $0x9d0] sm:$0xff] }
 0x1dd   :  { %v440_v37 = vor.u32 1.1754944e-38, %v439_v32  ;;  %vm438_vm12 = vcmp.eq.f32.partialorder %v437_v34, 8.507059e+37  ;;  %690 = vmatpush.msra.mxu2 %v646_v17  ;;  %711 = vmatpush.msra.mxu3 %v644_v22  ;;  %v634_v34 = vld [vmem:[#allocation8 + $0x660] sm:$0xff]  ;;  %v833_v17 = vld [vmem:[#allocation8 + $0x9f8] sm:$0xff]  ;;  %v826_v22 = vld [vmem:[#allocation8 + $0x9b0] sm:$0xff] }
 0x1de   :  { %731 = vmatpush.msrb.mxu0 %v645_v24  ;;  %844 = vmatpush.msrb.mxu1 %v828_v18  ;;  %v822_v24 = vld [vmem:[#allocation8 + $0x980] sm:$0xff] }
 0x1df   :  { %v1076_v26 = vpop.eup %1075  ;;  %691 = vmatpush.msra.mxu2 %v643_v21  ;;  %v825_v21 = vld [vmem:[#allocation8 + $0x9a0] sm:$0xff] }
 0x1e0   :  { %v427_v27 = vadd.f32 1.0, %v1076_v26  ;;  %v640_v26 = vld [vmem:[#allocation8 + $0x6a0] sm:$0xff]  ;;  %845 = vmatpush.msrb.mxu1 %v825_v21 }
 0x1e1   :  { %v1078_v28 = vpop.eup %1077  ;;  %692 = vmatpush.msra.mxu2 %v640_v26  ;;  %v824_v26 = vld [vmem:[#allocation8 + $0x998] sm:$0xff] }
 0x1e2   :  { %v429_v30 = vmul.f32 %v1078_v28, %v426_v23  ;;  %1079 = vrcp.f32 %v427_v27  ;;  %vm434_vm9 = vweird.f32 %v1078_v28  ;;  %v454_v45 = vand.u32 2147483648, %v427_v27  ;;  %846 = vmatpush.msrb.mxu1 %v822_v24 }
 0x1e3   :  { %1081 = vtanh.f32 %v398_v29  ;;  %vm435_vm11 = vmor %vm433_vm10, %vm434_vm9  ;;  %vm448_vm14 = vweird.f32 %v427_v27  ;;  %v452_v47 = vand.u32 2147483647, %v427_v27  ;;  %v515_v23 = vperm.slane %v1442_v5, 0 }
 0x1e4   :  { %v430_v31 = vsub.f32 1.0, %v429_v30  ;;  %v455_v49 = vor.u32 1.1754944e-38, %v454_v45  ;;  %v637_v30 = vld [vmem:[#allocation8 + $0x680] sm:$0xff]  ;;  %v630_v45 = vld [vmem:[#allocation8 + $0x638] sm:$0xff] }
 0x1e5   :  { %vm453_vm0 = vcmp.eq.f32.partialorder %v452_v47, 8.507059e+37  ;;  %693 = vmatpush.msra.mxu2 %v637_v30  ;;  %v626_v47 = vld [vmem:[#allocation8 + $0x610] sm:$0xff]  ;;  %v1447_v30 = vld [vmem:[#allocation10 + $0xc] sm:$0xf] }
 0x1e6   :  { %v431_v33 = vmul.f32 %v1078_v28, %v430_v31  ;;  %v638_v31 = vld [vmem:[#allocation8 + $0x690] sm:$0xff] }
 0x1e7   :  { %694 = vmatpush.msra.mxu2 %v634_v34  ;;  %v678_v34 = vperm.slane %v1447_v30, 3 }
 0x1e8   :  { %v1080_v35 = vpop.eup %1079  ;;  %v432_v36 = vadd.f32 %v1078_v28, %v431_v33  ;;  %v639_v33 = vld [vmem:[#allocation8 + $0x698] sm:$0xff] }
 0x1e9   :  { %v444_v38 = vmul.f32 %v1080_v35, %v427_v27  ;;  %v1082_v40 = vpop.eup %1081  ;;  %vm449_vm13 = vweird.f32 %v1080_v35  ;;  %v641_v27 = vld [vmem:[#allocation8 + $0x6b0] sm:$0xff] }
 0x1ea   :  { %v436_v39 = vsel %vm435_vm11, %v1078_v28, %v432_v36  ;;  %vm450_vm15 = vmor %vm448_vm14, %vm449_vm13  ;;  %v642_v28 = vld [vmem:[#allocation8 + $0x6b8] sm:$0xff]  ;;  %712 = vmatpush.msra.mxu3 %v641_v27  ;;  %v819_v27 = vld [vmem:[#allocation8 + $0x960] sm:$0xff] }
 0x1eb   :  { %v441_v41 = vsel %vm438_vm12, %v440_v37, %v436_v39  ;;  %v445_v42 = vsub.f32 1.0, %v444_v38  ;;  %732 = vmatpush.msrb.mxu0 %v642_v28  ;;  %v636_v37 = vld [vmem:[#allocation8 + $0x678] sm:$0xff]  ;;  %v631_v38 = vld [vmem:[#allocation8 + $0x640] sm:$0xff]  ;;  %v632_v39 = vld [vmem:[#allocation8 + $0x650] sm:$0xff]  ;;  %847 = vmatpush.msrb.mxu1 %v819_v27 }
 0x1ec   :  { %v459_v43 = vmul.f32 %v1082_v40, %v441_v41  ;;  %713 = vmatpush.msra.mxu3 %v638_v31  ;;  %v633_v40 = vld [vmem:[#allocation8 + $0x658] sm:$0xff]  ;;  %695 = vmatpush.msra.mxu2 %v631_v38  ;;  %v820_v28 = vld [vmem:[#allocation8 + $0x970] sm:$0xff]  ;;  %v816_v31 = vld [vmem:[#allocation8 + $0x940] sm:$0xff] }
 0x1ed   :  { %v446_v44 = vmul.f32 %v1080_v35, %v445_v42  ;;  %733 = vmatpush.msrb.mxu0 %v639_v33  ;;  %v628_v42 = vld [vmem:[#allocation8 + $0x620] sm:$0xff]  ;;  %v818_v33 = vld [vmem:[#allocation8 + $0x958] sm:$0xff]  ;;  %848 = vmatpush.msrb.mxu1 %v816_v31 }
 0x1ee   :  { %1083 = vtanh.f32 %v459_v43  ;;  %v629_v43 = vld [vmem:[#allocation8 + $0x630] sm:$0xff]  ;;  %696 = vmatpush.msra.mxu2 %v628_v42  ;;  %v810_v38 = vld [vmem:[#allocation8 + $0x900] sm:$0xff] }
 0x1ef   :  { %v447_v46 = vadd.f32 %v1080_v35, %v446_v44  ;;  %734 = vmatpush.msrb.mxu0 %v636_v37  ;;  %v815_v37 = vld [vmem:[#allocation8 + $0x938] sm:$0xff] }
 0x1f1   :  { %v451_v48 = vsel %vm450_vm15, %v1080_v35, %v447_v46  ;;  %v635_v35 = vld [vmem:[#allocation8 + $0x670] sm:$0xff]  ;;  %735 = vmatpush.msrb.mxu0 %v633_v40  ;;  %v625_v46 = vld [vmem:[#allocation8 + $0x600] sm:$0xff]  ;;  %v812_v40 = vld [vmem:[#allocation8 + $0x918] sm:$0xff] }
 0x1f2   :  { %v456_v51 = vsel %vm453_vm0, %v455_v49, %v451_v48  ;;  %714 = vmatpush.msra.mxu3 %v635_v35  ;;  %v627_v48 = vld [vmem:[#allocation8 + $0x618] sm:$0xff]  ;;  %697 = vmatpush.msra.mxu2 %v625_v46  ;;  %v813_v35 = vld [vmem:[#allocation8 + $0x920] sm:$0xff]  ;;  %v676_v46 = vperm.slane %v1447_v30, 0 }
 0x1f3   :  { %736 = vmatpush.msrb.mxu0 %v630_v45  ;;  %849 = vmatpush.msrb.mxu1 %v813_v35  ;;  %v809_v45 = vld [vmem:[#allocation8 + $0x8f8] sm:$0xff] }
 0x1f4   :  { %v1084_v50 = vpop.eup %1083  ;;  %715 = vmatpush.msra.mxu3 %v632_v39  ;;  %v811_v39 = vld [vmem:[#allocation8 + $0x910] sm:$0xff] }
 0x1f5   :  { %v461_v52 = vmul.f32 %v1084_v50, %v456_v51  ;;  %737 = vmatpush.msrb.mxu0 %v627_v48  ;;  %v516_v51 = vperm.slane %v1442_v5, 2  ;;  %850 = vmatpush.msrb.mxu1 %v810_v38  ;;  %v804_v48 = vld [vmem:[#allocation8 + $0x8c0] sm:$0xff] }
 0x1f6   :  { %716 = vmatpush.msra.mxu3 %v629_v43  ;;  %v807_v43 = vld [vmem:[#allocation8 + $0x8e0] sm:$0xff] }
 0x1f7   :  { %462 = vst [vmem:[#allocation14 + $0x1] sm:$0x1] %v461_v52  ;;  %537 = vmatmul.f32.vlgmr.msrb.gmra.mxu3 %v461_v52  ;;  %557 = vmatmul.f32.vlgmr.msra.gmra.mxu0 %v461_v52 }
 0x1f8   :  { %577 = vmatmul.f32.vlgmr.msra.gmra.mxu1 %v461_v52  ;;  %717 = vmatpush.msra.mxu3 %v626_v47 }
 0x1f9   :  { %851 = vmatpush.msrb.mxu1 %v807_v43 }
 0x1fa   :  { %883 = vmatpush.msrb.mxu3 %v833_v17 }
 0x1fb   :  { %852 = vmatpush.msrb.mxu1 %v804_v48 }
 0x274   :  { %v558_v53 = vpop.f32.mrf.mxu0 }
 0x275   :  { %v578_v16 = vpop.f32.mrf.mxu1  ;;  %v559_v55 = vadd.f32 %v558_v53, %v516_v51  ;;  %v802_v53 = vld [vmem:[#allocation8 + $0x8b0] sm:$0xff] }
 0x276   :  { %v579_v20 = vadd.f32 %v578_v16, %v517_v9  ;;  %v832_v16 = vld [vmem:[#allocation8 + $0x9f0] sm:$0xff] }
 0x277   :  { %863 = vmatpush.msrb.mxu2 %v832_v16 }
 0x278   :  { %v1039_v25 = vmul.f32 -1.442695, %v579_v20  ;;  %v830_v20 = vld [vmem:[#allocation8 + $0x9d8] sm:$0xff] }
 0x279   :  { %864 = vmatpush.msrb.mxu2 %v829_v19  ;;  %884 = vmatpush.msrb.mxu3 %v830_v20 }
 0x27a   :  { %1085 = vpow2.f32 %v1039_v25  ;;  %v538_v29 = vpop.f32.mrf.mxu3  ;;  %v823_v25 = vld [vmem:[#allocation8 + $0x990] sm:$0xff] }
 0x27b   :  { %v539_v32 = vadd.f32 %v538_v29, %v515_v23  ;;  %v827_v23 = vld [vmem:[#allocation8 + $0x9b8] sm:$0xff]  ;;  %865 = vmatpush.msrb.mxu2 %v826_v22 }
 0x27c   :  { %885 = vmatpush.msrb.mxu3 %v827_v23  ;;  %v821_v29 = vld [vmem:[#allocation8 + $0x978] sm:$0xff] }
 0x27d   :  { %v1038_v36 = vmul.f32 -1.442695, %v539_v32  ;;  %866 = vmatpush.msrb.mxu2 %v823_v25  ;;  %v817_v32 = vld [vmem:[#allocation8 + $0x950] sm:$0xff] }
 0x27e   :  { %886 = vmatpush.msrb.mxu3 %v824_v26 }
 0x27f   :  { %1087 = vpow2.f32 %v1038_v36  ;;  %867 = vmatpush.msrb.mxu2 %v820_v28  ;;  %v814_v36 = vld [vmem:[#allocation8 + $0x930] sm:$0xff] }
 0x280   :  { %v1086_v41 = vpop.eup %1085  ;;  %887 = vmatpush.msrb.mxu3 %v821_v29 }
 0x281   :  { %v588_v44 = vadd.f32 1.0, %v1086_v41  ;;  %868 = vmatpush.msrb.mxu2 %v817_v32 }
 0x282   :  { %888 = vmatpush.msrb.mxu3 %v818_v33 }
 0x283   :  { %1089 = vrcp.f32 %v588_v44  ;;  %v615_v8 = vand.u32 2147483648, %v588_v44  ;;  %vm609_vm6 = vweird.f32 %v588_v44  ;;  %v613_v9 = vand.u32 2147483647, %v588_v44  ;;  %869 = vmatpush.msrb.mxu2 %v814_v36 }
 0x284   :  { %889 = vmatpush.msrb.mxu3 %v815_v37 }
 0x285   :  { %v1088_v49 = vpop.eup %1087  ;;  %v616_v11 = vor.u32 1.1754944e-38, %v615_v8  ;;  %vm614_vm8 = vcmp.eq.f32.partialorder %v613_v9, 8.507059e+37  ;;  %870 = vmatpush.msrb.mxu2 %v811_v39  ;;  %v786_v8 = vld [vmem:[#allocation8 + $0x800] sm:$0xff]  ;;  %v787_v9 = vld [vmem:[#allocation8 + $0x810] sm:$0xff] }
 0x286   :  { %v587_v50 = vadd.f32 1.0, %v1088_v49  ;;  %890 = vmatpush.msrb.mxu3 %v812_v40  ;;  %v805_v49 = vld [vmem:[#allocation8 + $0x8d0] sm:$0xff] }
 0x287   :  { %v835_v40 = vld [vmem:[#allocation10 + $0x10] sm:$0xf] }
 0x288   :  { %1091 = vrcp.f32 %v587_v50  ;;  %v600_v60 = vand.u32 2147483648, %v587_v50  ;;  %v598_v62 = vand.u32 2147483647, %v587_v50  ;;  %vm594_vm2 = vweird.f32 %v587_v50  ;;  %891 = vmatpush.msrb.mxu3 %v809_v45 }
 0x289   :  { %v1090_v52 = vpop.eup %1089  ;;  %1093 = vtanh.f32 %v559_v55  ;;  %v839_v45 = vperm.slane %v835_v40, 3 }
 0x28a   :  { %v605_v56 = vmul.f32 %v1090_v52, %v588_v44  ;;  %v601_v0 = vor.u32 1.1754944e-38, %v600_v60  ;;  %vm599_vm4 = vcmp.eq.f32.partialorder %v598_v62, 8.507059e+37  ;;  %vm610_vm5 = vweird.f32 %v1090_v52  ;;  %v808_v44 = vld [vmem:[#allocation8 + $0x8f0] sm:$0xff]  ;;  %v797_v62 = vld [vmem:[#allocation8 + $0x878] sm:$0xff] }
 0x28b   :  { %vm611_vm7 = vmor %vm609_vm6, %vm610_vm5  ;;  %871 = vmatpush.msrb.mxu2 %v808_v44  ;;  %v796_v60 = vld [vmem:[#allocation8 + $0x870] sm:$0xff] }
 0x28c   :  { %v606_v59 = vsub.f32 1.0, %v605_v56  ;;  %v798_v56 = vld [vmem:[#allocation8 + $0x880] sm:$0xff] }
 0x28d   :  { %872 = vmatpush.msrb.mxu2 %v805_v49 }
 0x28e   :  { %v1092_v54 = vpop.eup %1091  ;;  %v607_v1 = vmul.f32 %v1090_v52, %v606_v59  ;;  %v795_v59 = vld [vmem:[#allocation8 + $0x860] sm:$0xff] }
 0x28f   :  { %v590_v57 = vmul.f32 %v1092_v54, %v587_v50  ;;  %vm595_vm1 = vweird.f32 %v1092_v54  ;;  %v1094_v4 = vpop.eup %1093  ;;  %v806_v50 = vld [vmem:[#allocation8 + $0x8d8] sm:$0xff]  ;;  %873 = vmatpush.msrb.mxu2 %v802_v53 }
 0x290   :  { %vm596_vm3 = vmor %vm594_vm2, %vm595_vm1  ;;  %v608_v7 = vadd.f32 %v1090_v52, %v607_v1  ;;  %892 = vmatpush.msrb.mxu3 %v806_v50  ;;  %v794_v1 = vld [vmem:[#allocation8 + $0x858] sm:$0xff] }
 0x291   :  { %v591_v58 = vsub.f32 1.0, %v590_v57  ;;  %v799_v57 = vld [vmem:[#allocation8 + $0x890] sm:$0xff] }
 0x292   :  { %v612_v10 = vsel %vm611_vm7, %v1090_v52, %v608_v7  ;;  %v801_v52 = vld [vmem:[#allocation8 + $0x8a0] sm:$0xff]  ;;  %874 = vmatpush.msrb.mxu2 %v799_v57  ;;  %v791_v7 = vld [vmem:[#allocation8 + $0x838] sm:$0xff] }
 0x293   :  { %v592_v61 = vmul.f32 %v1092_v54, %v591_v58  ;;  %v617_v13 = vsel %vm614_vm8, %v616_v11, %v612_v10  ;;  %853 = vmatpush.msrb.mxu1 %v801_v52  ;;  %v800_v58 = vld [vmem:[#allocation8 + $0x898] sm:$0xff] }
 0x294   :  { %875 = vmatpush.msrb.mxu2 %v796_v60  ;;  %v788_v10 = vld [vmem:[#allocation8 + $0x818] sm:$0xff] }
 0x295   :  { %v593_v63 = vadd.f32 %v1092_v54, %v592_v61  ;;  %854 = vmatpush.msrb.mxu1 %v798_v56 }
 0x297   :  { %v597_v3 = vsel %vm596_vm3, %v1092_v54, %v593_v63  ;;  %v803_v54 = vld [vmem:[#allocation8 + $0x8b8] sm:$0xff]  ;;  %v792_v63 = vld [vmem:[#allocation8 + $0x840] sm:$0xff]  ;;  %855 = vmatpush.msrb.mxu1 %v795_v59 }
 0x298   :  { %v602_v5 = vsel %vm599_vm4, %v601_v0, %v597_v3  ;;  %893 = vmatpush.msrb.mxu3 %v803_v54  ;;  %v793_v0 = vld [vmem:[#allocation8 + $0x850] sm:$0xff] }
 0x299   :  { %v620_v6 = vmul.f32 %v1094_v4, %v602_v5  ;;  %v789_v4 = vld [vmem:[#allocation8 + $0x820] sm:$0xff]  ;;  %v790_v5 = vld [vmem:[#allocation8 + $0x830] sm:$0xff]  ;;  %856 = vmatpush.msrb.mxu1 %v792_v63  ;;  %876 = vmatpush.msrb.mxu2 %v793_v0 }
 0x29a   :  { %894 = vmatpush.msrb.mxu3 %v800_v58 }
 0x29b   :  { %1095 = vtanh.f32 %v620_v6  ;;  %857 = vmatpush.msrb.mxu1 %v789_v4  ;;  %877 = vmatpush.msrb.mxu2 %v790_v5 }
 0x29c   :  { %895 = vmatpush.msrb.mxu3 %v797_v62 }
 0x29d   :  { %858 = vmatpush.msrb.mxu1 %v786_v8  ;;  %878 = vmatpush.msrb.mxu2 %v787_v9 }
 0x29e   :  { %896 = vmatpush.msrb.mxu3 %v794_v1 }
 0x2a0   :  { %897 = vmatpush.msrb.mxu3 %v791_v7 }
 0x2a1   :  { %v1096_v12 = vpop.eup %1095 }
 0x2a2   :  { %v622_v14 = vmul.f32 %v1096_v12, %v617_v13  ;;  %898 = vmatpush.msrb.mxu3 %v788_v10  ;;  %v677_v13 = vperm.slane %v1447_v30, 2 }
 0x2a4   :  { %623 = vst [vmem:[#allocation14 + $0x2] sm:$0x1] %v622_v14  ;;  %698 = vmatmul.f32.vlgmr.msra.gmra.mxu2 %v622_v14  ;;  %718 = vmatmul.f32.vlgmr.msra.gmra.mxu3 %v622_v14 }
 0x2a5   :  { %738 = vmatmul.f32.vlgmr.msrb.gmra.mxu0 %v622_v14 }
 0x322   :  { %v739_v41 = vpop.f32.mrf.mxu0 }
 0x323   :  { %v740_v42 = vadd.f32 %v739_v41, %v678_v34  ;;  %v837_v41 = vperm.slane %v835_v40, 0 }
 0x325   :  { %v1041_v47 = vmul.f32 -1.442695, %v740_v42 }
 0x327   :  { %1097 = vpow2.f32 %v1041_v47  ;;  %v699_v51 = vpop.f32.mrf.mxu2  ;;  %v719_v15 = vpop.f32.mrf.mxu3 }
 0x328   :  { %v700_v55 = vadd.f32 %v699_v51, %v676_v46  ;;  %v720_v18 = vadd.f32 %v719_v15, %v677_v13  ;;  %v838_v51 = vperm.slane %v835_v40, 2 }
 0x32a   :  { %v1040_v61 = vmul.f32 -1.442695, %v700_v55 }
 0x32c   :  { %1099 = vpow2.f32 %v1040_v61 }
 0x32d   :  { %v1098_v3 = vpop.eup %1097 }
 0x32e   :  { %v749_v6 = vadd.f32 1.0, %v1098_v3 }
 0x330   :  { %1101 = vrcp.f32 %v749_v6  ;;  %v776_v33 = vand.u32 2147483648, %v749_v6  ;;  %vm770_vm14 = vweird.f32 %v749_v6  ;;  %v774_v34 = vand.u32 2147483647, %v749_v6 }
 0x332   :  { %v1100_v11 = vpop.eup %1099  ;;  %v777_v36 = vor.u32 1.1754944e-38, %v776_v33  ;;  %vm775_vm0 = vcmp.eq.f32.partialorder %v774_v34, 8.507059e+37 }
 0x333   :  { %v748_v12 = vadd.f32 1.0, %v1100_v11 }
 0x335   :  { %1103 = vrcp.f32 %v748_v12  ;;  %v761_v22 = vand.u32 2147483648, %v748_v12  ;;  %v759_v24 = vand.u32 2147483647, %v748_v12  ;;  %vm755_vm10 = vweird.f32 %v748_v12 }
 0x336   :  { %v1102_v14 = vpop.eup %1101  ;;  %1105 = vtanh.f32 %v720_v18 }
 0x337   :  { %v766_v17 = vmul.f32 %v1102_v14, %v749_v6  ;;  %v762_v26 = vor.u32 1.1754944e-38, %v761_v22  ;;  %vm760_vm12 = vcmp.eq.f32.partialorder %v759_v24, 8.507059e+37  ;;  %vm771_vm13 = vweird.f32 %v1102_v14 }
 0x338   :  { %vm772_vm15 = vmor %vm770_vm14, %vm771_vm13 }
 0x339   :  { %v767_v21 = vsub.f32 1.0, %v766_v17 }
 0x33b   :  { %v1104_v16 = vpop.eup %1103  ;;  %v768_v27 = vmul.f32 %v1102_v14, %v767_v21 }
 0x33c   :  { %v751_v19 = vmul.f32 %v1104_v16, %v748_v12  ;;  %vm756_vm9 = vweird.f32 %v1104_v16  ;;  %v1106_v29 = vpop.eup %1105 }
 0x33d   :  { %vm757_vm11 = vmor %vm755_vm10, %vm756_vm9  ;;  %v769_v32 = vadd.f32 %v1102_v14, %v768_v27  ;;  %vm949_vm9 = vcmask 1040384  }
 0x33e   :  { %v752_v20 = vsub.f32 1.0, %v751_v19 }
 0x33f   :  { %v773_v35 = vsel %vm772_vm15, %v1102_v14, %v769_v32 }
 0x340   :  { %v753_v23 = vmul.f32 %v1104_v16, %v752_v20  ;;  %v778_v38 = vsel %vm775_vm0, %v777_v36, %v773_v35 }
 0x342   :  { %v754_v25 = vadd.f32 %v1104_v16, %v753_v23 }
 0x344   :  { %v758_v28 = vsel %vm757_vm11, %v1104_v16, %v754_v25 }
 0x345   :  { %v763_v30 = vsel %vm760_vm12, %v762_v26, %v758_v28  ;;  %v962_v26 = vlaneseq }
 0x346   :  { %v781_v31 = vmul.f32 %v1106_v29, %v763_v30 }
 0x347   :  { %v963_v27 = vand.u32 127, %v962_v26 }
 0x348   :  { %1107 = vtanh.f32 %v781_v31 }
 0x349   :  { %vm964_vm10 = vcmp.eq.s32.totalorder %v963_v27, 0 }
 0x34e   :  { %v1108_v37 = vpop.eup %1107 }
 0x34f   :  { %v783_v39 = vmul.f32 %v1108_v37, %v778_v38 }
 0x351   :  { %784 = vst [vmem:[#allocation14 + $0x3] sm:$0x1] %v783_v39  ;;  %859 = vmatmul.f32.vlgmr.msrb.gmra.mxu1 %v783_v39  ;;  %879 = vmatmul.f32.vlgmr.msrb.gmra.mxu2 %v783_v39 }
 0x352   :  { %899 = vmatmul.f32.vlgmr.msrb.gmra.mxu3 %v783_v39 }
 0x3ce   :  { %v860_v42 = vpop.f32.mrf.mxu1 }
 0x3cf   :  { %v861_v43 = vadd.f32 %v860_v42, %v837_v41 }
 0x3d1   :  { %v1042_v44 = vmul.f32 -1.442695, %v861_v43 }
 0x3d3   :  { %1109 = vpow2.f32 %v1042_v44 }
 0x3d4   :  { %v880_v52 = vpop.f32.mrf.mxu2 }
 0x3d5   :  { %v900_v46 = vpop.f32.mrf.mxu3  ;;  %v881_v56 = vadd.f32 %v880_v52, %v838_v51 }
 0x3d6   :  { %v901_v47 = vadd.f32 %v900_v46, %v839_v45 }
 0x3d8   :  { %v1043_v48 = vmul.f32 -1.442695, %v901_v47 }
 0x3d9   :  { %v1110_v49 = vpop.eup %1109 }
 0x3da   :  { %v909_v50 = vadd.f32 1.0, %v1110_v49  ;;  %1111 = vpow2.f32 %v1043_v48 }
 0x3dc   :  { %1113 = vrcp.f32 %v909_v50  ;;  %v922_v59 = vand.u32 2147483648, %v909_v50  ;;  %v920_v61 = vand.u32 2147483647, %v909_v50  ;;  %vm916_vm2 = vweird.f32 %v909_v50 }
 0x3de   :  { %v923_v0 = vor.u32 1.1754944e-38, %v922_v59  ;;  %vm921_vm4 = vcmp.eq.f32.partialorder %v920_v61, 8.507059e+37 }
 0x3e0   :  { %v1112_v53 = vpop.eup %1111 }
 0x3e1   :  { %v910_v54 = vadd.f32 1.0, %v1112_v53 }
 0x3e2   :  { %v1114_v55 = vpop.eup %1113 }
 0x3e3   :  { %v912_v57 = vmul.f32 %v1114_v55, %v909_v50  ;;  %1115 = vrcp.f32 %v910_v54  ;;  %vm917_vm1 = vweird.f32 %v1114_v55  ;;  %v937_v9 = vand.u32 2147483648, %v910_v54 }
 0x3e4   :  { %1117 = vtanh.f32 %v881_v56  ;;  %vm918_vm3 = vmor %vm916_vm2, %vm917_vm1  ;;  %vm931_vm6 = vweird.f32 %v910_v54  ;;  %v935_v11 = vand.u32 2147483647, %v910_v54 }
 0x3e5   :  { %v913_v58 = vsub.f32 1.0, %v912_v57  ;;  %v938_v13 = vor.u32 1.1754944e-38, %v937_v9 }
 0x3e6   :  { %vm936_vm8 = vcmp.eq.f32.partialorder %v935_v11, 8.507059e+37 }
 0x3e7   :  { %v914_v60 = vmul.f32 %v1114_v55, %v913_v58 }
 0x3e9   :  { %v1116_v62 = vpop.eup %1115  ;;  %v915_v63 = vadd.f32 %v1114_v55, %v914_v60 }
 0x3ea   :  { %v927_v1 = vmul.f32 %v1116_v62, %v910_v54  ;;  %v1118_v4 = vpop.eup %1117  ;;  %vm932_vm5 = vweird.f32 %v1116_v62 }
 0x3eb   :  { %v919_v3 = vsel %vm918_vm3, %v1114_v55, %v915_v63  ;;  %vm933_vm7 = vmor %vm931_vm6, %vm932_vm5 }
 0x3ec   :  { %v924_v5 = vsel %vm921_vm4, %v923_v0, %v919_v3  ;;  %v928_v6 = vsub.f32 1.0, %v927_v1 }
 0x3ed   :  { %v942_v7 = vmul.f32 %v1118_v4, %v924_v5 }
 0x3ee   :  { %v929_v8 = vmul.f32 %v1116_v62, %v928_v6 }
 0x3ef   :  { %1119 = vtanh.f32 %v942_v7 }
 0x3f0   :  { %v930_v10 = vadd.f32 %v1116_v62, %v929_v8 }
 0x3f2   :  { %v934_v12 = vsel %vm933_vm7, %v1116_v62, %v930_v10 }
 0x3f3   :  { %v939_v15 = vsel %vm936_vm8, %v938_v13, %v934_v12 }
 0x3f5   :  { %v1120_v14 = vpop.eup %1119 }
 0x3f6   :  { %v944_v16 = vmul.f32 %v1120_v14, %v939_v15 }
 0x3f8   :  { %945 = vst [vmem:[#allocation14 + $0x4] sm:$0x1] %v944_v16  ;;  %v947_v17 = vsub.f32 %v1426_v2, %v944_v16 }
 0x3f9   :  { %946 = vst [vmem:[#allocation12] sm:$0x1] %v944_v16 }
 0x3fa   :  { %v948_v18 = vmul.f32 %v947_v17, %v947_v17  ;;  %988 = dma.vmem_to_hbm [thread:$0]  %s984_s4, 16, %s986_s13, [#allocation13]  }
 0x3fb   :  { %999 = dma.vmem_to_hbm [thread:$0]  %s995_s19, 128, %s997_s22, [#allocation13]  }
 0x3fc   :  { %v950_v19 = vsel %vm949_vm9, %v948_v18, 0.0 }
 0x3fd   :  { %951 = vadd.xlane.f32.xlu0 %v950_v19 }
 0x470   :  { %v952_v2 = vpop.xlane.xlu0 %951 }
 0x471   :  { %v953_v20 = vrot.slane %v952_v2, 4 }
 0x473   :  { %v954_v21 = vadd.f32 %v953_v20, %v952_v2 }
 0x475   :  { %v955_v22 = vrot.slane %v954_v21, 2 }
 0x477   :  { %v956_v23 = vadd.f32 %v955_v22, %v954_v21 }
 0x479   :  { %v957_v24 = vrot.slane %v956_v23, 1 }
 0x47b   :  { %v958_v25 = vadd.f32 %v957_v24, %v956_v23 }
 0x47d   :  { %1044 = vpush %v958_v25 }
 0x4ae   :  { %s1045_s3 = spop %1044 }
 0x4af   :  { %v960_v28 = vstv %s1045_s3 }
 0x4b0   :  { %v961_v29 = vmul.f32 0.03125, %v960_v28 }
 0x4b2   :  { %v965_v30 = vsel %vm964_vm10, %v961_v29, 0.0 }
 0x4b3   :  { %966 = vst [vmem:[#allocation15] sm:$0x1] %v965_v30 }
 0x4b4   :  { %1010 = dma.vmem_to_hbm [thread:$0]  %s1006_s7, 16, %s1008_s23, [#allocation16]  }
 0x4b5   :  { %1343 = dma.done.wait [#allocation4], 16  }
 0x4b6   :  { %1344 = vsyncadd [#allocation4], 4294967280 }
 0x4b7   :  { %1345 = dma.done.wait [#allocation13], 144  }
 0x4b8   :  { %1346 = vsyncadd [#allocation13], 4294967152 }
 0x4b9   :  { %1347 = dma.done.wait [#allocation16], 16  }
 0x4ba   :  { %1348 = vsyncadd [#allocation16], 4294967280 }
 0x4bb   :  { %1027 = vsyncpa [#allocation3], 1 }
 0x4bc   :  { %1028 = vsyncpa [#allocation6], 1 }
 0x4bd   :  { %1029 = vsyncpa [#allocation9], 1 }
 0x4be   :  { %1030 = vsyncpa [#allocation4], 1 }
 0x4bf   :  { %1031 = vsyncpa [#allocation13], 1 }
 0x4c0   :  { %1032 = vsyncpa [#allocation16], 1 }

</bundles_post_ra>
